<compile_context>
chip_gen: v7x
topology: tpu7x:2x2x1
jax: 0.10.0
libtpu: 0.0.40
codegen_flags: <defaults>
</compile_context>

<pallas_src>
import jax
import jax.numpy as jnp
from jax.experimental import pallas as pl
from jax.experimental.pallas import tpu as pltpu

BASIS = 15  # number of 2->2 equivariant basis operations


def unique_eq2_kernel(x_ref, w1_ref, b1_ref, w2_ref, b2_ref,
                      cd_ref, cnode_ref, cbatch_ref,
                      eqb_ref, eqdb_ref, w3_ref, b3_ref, w4_ref, b4_ref,
                      o_ref):
    bt, n, in_dim = x_ref.shape
    hid = w1_ref.shape[1]
    out_dim = w3_ref.shape[1]
    f32 = jnp.float32

    def mm(a, b):
        return jnp.dot(a, b, preferred_element_type=f32)

    # ---- embed MLP over all bt*n nodes at once: Linear->ReLU->Linear->ReLU ----
    x = x_ref[...].reshape(bt * n, in_dim)
    h = jnp.maximum(mm(x, w1_ref[...]) + b1_ref[...], 0.0)
    h = jnp.maximum(mm(h, w2_ref[...]) + b2_ref[...], 0.0)           # (bt*n, hid)
    h3 = h.reshape(bt, n, hid)

    # ---- O(n*hid) summaries of T computed directly from h (T is symmetric) ----
    hh = h * h                                                        # diag of T
    c = jnp.sum(h3, axis=1)                                           # (bt, hid)
    r = (h3 * c[:, None, :]).reshape(bt * n, hid)                     # row/col sums of T
    sd = jnp.sum(hh.reshape(bt, n, hid), axis=1)                      # (bt, hid) trace
    sa = c * c                                                        # (bt, hid) total sum

    # ---- per-structure coef contractions (coef slices pre-folded host side) ----
    rowv = mm(r, cnode_ref[0]) + mm(hh, cnode_ref[1])                 # depends on i only
    colv = mm(r, cnode_ref[2]) + mm(hh, cnode_ref[3])                 # depends on j only
    dnod = mm(r, cnode_ref[4]) + mm(hh, cnode_ref[5])                 # diagonal, per node
    dbat = mm(sd, cbatch_ref[0]) + mm(sa, cbatch_ref[1])              # diagonal, per sample
    cstv = mm(sd, cbatch_ref[2]) + mm(sa, cbatch_ref[3])              # constant, per sample

    # ---- dense term: only T itself needs a full (bt*n*n, hid) MXU matmul ----
    T = h3[:, :, None, :] * h3[:, None, :, :]                         # (bt, n, n, hid)
    dense = mm(T.reshape(bt * n * n, hid), cd_ref[...])               # (bt*n*n, hid)
    eq = dense.reshape(bt, n, n, hid)

    # ---- assemble Eq2to2 output + biases, ReLU (Net2to2 nonlinearity) ----
    row_i = jax.lax.broadcasted_iota(jnp.int32, (n, n), 0)
    col_j = jax.lax.broadcasted_iota(jnp.int32, (n, n), 1)
    eye4 = (row_i == col_j).astype(f32)[None, :, :, None]             # (1, n, n, 1)
    diagv = dnod.reshape(bt, n, hid) + dbat[:, None, :] + eqdb_ref[...]

    eq = (eq
          + rowv.reshape(bt, n, 1, hid)
          + colv.reshape(bt, 1, n, hid)
          + (cstv + eqb_ref[...])[:, None, None, :]
          + eye4 * diagv[:, :, None, :])
    eq = jnp.maximum(eq, 0.0)

    # ---- Net2to2 out_net -> ReLU -> sum over (i, j) -> ReLU -> Linear(out,1) ----
    y = mm(eq.reshape(bt * n * n, hid), w3_ref[...]) + b3_ref[...]    # (bt*n*n, out_dim)
    y = jnp.maximum(y, 0.0)
    pooled = jnp.sum(y.reshape(bt, n * n, out_dim), axis=1)           # (bt, out_dim)
    pooled = jnp.maximum(pooled, 0.0)
    out = mm(pooled, w4_ref[...]) + b4_ref[...]                       # (bt, 1)
    o_ref[0] = out


def _pick_block_batch(B, n, target_rows=256, max_rows=4096):
    """Largest divisor of B such that bt*n*n stays VMEM-friendly, preferring the
    smallest one that already fills the MXU M dimension (>= target_rows)."""
    bt = 1
    for d in range(2, B + 1):
        if B % d:
            continue
        if d * n * n > max_rows:
            break
        bt = d
        if d * n * n >= target_rows:
            break
    return bt


def unique_eq2_forward(x, params, block_batch=None):
    (w1, b1, w2, b2, coefs, eq_b, eq_db, w3, b3, w4, b4) = params
    B, n, in_dim = x.shape
    hid = w1.shape[1]
    out_dim = w3.shape[1]

    bt = _pick_block_batch(B, n) if block_batch is None else block_batch
    assert B % bt == 0
    nblk = B // bt
    fn = float(n)

    # ---- host-side algebraic decomposition of the 15-basis contraction ------
    # C[k] is the (d_in, s_out) coef slice of basis op k+1.  'inf' normalization
    # (1/n, 1/n^2) and the symmetry-induced duplicate ops are folded here once.
    C = [coefs[:, :, k] for k in range(BASIS)]
    cd = C[9] + C[10]                       # ops 10, 11: T and T^T (T symmetric)
    cnode = jnp.stack([
        (C[5] + C[6]) / fn,                 # row-broadcast term  <- row sums (ops 6, 7)
        C[11],                              # row-broadcast term  <- diag     (op 12)
        (C[7] + C[8]) / fn,                 # col-broadcast term  <- row sums (ops 8, 9)
        C[12],                              # col-broadcast term  <- diag     (op 13)
        (C[2] + C[3]) / fn,                 # diagonal-only term  <- row sums (ops 3, 4)
        C[0],                               # diagonal-only term  <- diag     (op 1)
    ])                                      # (6, hid, hid)
    cbatch = jnp.stack([
        C[1] / fn,                          # diagonal-only term  <- trace    (op 2)
        C[4] / (fn * fn),                   # diagonal-only term  <- total    (op 5)
        C[13] / fn,                         # constant term       <- trace    (op 14)
        C[14] / (fn * fn),                  # constant term       <- total    (op 15)
    ])                                      # (4, hid, hid)

    b1r = b1.reshape(1, hid)
    b2r = b2.reshape(1, hid)
    eqbr = eq_b.reshape(1, hid)
    eqdbr = eq_db.reshape(1, hid)
    b3r = b3.reshape(1, out_dim)
    b4r = b4.reshape(1, 1)

    def const_spec(arr):
        zeros = (0,) * arr.ndim
        return pl.BlockSpec(arr.shape, lambda b, _z=zeros: _z)

    out = pl.pallas_call(
        unique_eq2_kernel,
        out_shape=jax.ShapeDtypeStruct((nblk, bt, 1), jnp.float32),
        grid_spec=pltpu.PrefetchScalarGridSpec(
            num_scalar_prefetch=0,
            grid=(nblk,),
            in_specs=[
                pl.BlockSpec((bt, n, in_dim), lambda b: (b, 0, 0)),
                const_spec(w1), const_spec(b1r), const_spec(w2), const_spec(b2r),
                const_spec(cd), const_spec(cnode), const_spec(cbatch),
                const_spec(eqbr), const_spec(eqdbr),
                const_spec(w3), const_spec(b3r), const_spec(w4), const_spec(b4r),
            ],
            out_specs=pl.BlockSpec((1, bt, 1), lambda b: (b, 0, 0)),
        ),
        compiler_params=pltpu.CompilerParams(
            dimension_semantics=("parallel",)),
    )(x, w1, b1r, w2, b2r, cd, cnode, cbatch, eqbr, eqdbr, w3, b3r, w4, b4r)
    return out.reshape(B, 1)


# ----------------------- plain-JAX reference (torch layout) -----------------------
def ref_forward(x, params):
    w1, b1, w2, b2, coefs, eq_b, eq_db, w3, b3, w4, b4 = params
    h = jax.nn.relu(x @ w1 + b1)
    h = jax.nn.relu(h @ w2 + b2)                                      # (B, n, hid)
    T = jnp.einsum('bid,bjd->bdij', h, h)                             # (B, hid, n, n)
    m = T.shape[-1]
    fdim = float(m)
    eye = jnp.eye(m, dtype=T.dtype)

    diag = jnp.diagonal(T, axis1=-2, axis2=-1)                        # (B, D, m)
    sum_diag = diag.sum(-1)                                           # (B, D)
    sum_rows = T.sum(-1)                                              # (B, D, m)
    sum_cols = T.sum(-2)                                              # (B, D, m)
    sum_all = sum_rows.sum(-1)                                        # (B, D)

    de = lambda v: v[..., :, None] * eye                              # diag_embed
    ball = lambda s: s[..., None, None] * jnp.ones((m, m), T.dtype)

    ops = [
        de(diag),
        de(jnp.broadcast_to(sum_diag[..., None], diag.shape)) / fdim,
        de(sum_rows) / fdim,
        de(sum_cols) / fdim,
        de(jnp.broadcast_to(sum_all[..., None], diag.shape)) / (fdim ** 2),
        jnp.broadcast_to(sum_cols[..., :, None], T.shape) / fdim,
        jnp.broadcast_to(sum_rows[..., :, None], T.shape) / fdim,
        jnp.broadcast_to(sum_cols[..., None, :], T.shape) / fdim,
        jnp.broadcast_to(sum_rows[..., None, :], T.shape) / fdim,
        T,
        jnp.swapaxes(T, -1, -2),
        jnp.broadcast_to(diag[..., :, None], T.shape),
        jnp.broadcast_to(diag[..., None, :], T.shape),
        ball(sum_diag) / fdim,
        ball(sum_all) / (fdim ** 2),
    ]
    ops = jnp.stack(ops, axis=2)                                      # (B, D, 15, m, m)
    out = jnp.einsum('dsb,ndbij->nsij', coefs, ops)
    out = out + eq_b[None, :, None, None] + eye[None, None] * eq_db[None, :, None, None]
    out = jax.nn.relu(out)                                            # Net2to2 ReLU
    out = jnp.einsum('bdij,de->bije', out, w3) + b3                   # out_net (channels last)
    out = jax.nn.relu(out)
    out = out.sum(axis=(1, 2))                                        # sum dims (-3,-2)
    out = jax.nn.relu(out)
    return out @ w4 + b4                                              # (B, 1)


def init_params(key, in_dim, hid, out_dim):
    ks = jax.random.split(key, 8)

    def lin(k, fi, fo):
        k1, k2 = jax.random.split(k)
        lim = 1.0 / (fi ** 0.5)
        w = jax.random.uniform(k1, (fi, fo), jnp.float32, -lim, lim)
        b = jax.random.uniform(k2, (fo,), jnp.float32, -lim, lim)
        return w, b

    w1, b1 = lin(ks[0], in_dim, hid)
    w2, b2 = lin(ks[1], hid, hid)
    coefs = jax.random.normal(ks[2], (hid, hid, BASIS), jnp.float32) * \
        ((2.0 / (hid + hid + BASIS)) ** 0.5)
    eq_b = 0.01 * jax.random.normal(ks[3], (hid,), jnp.float32)
    eq_db = 0.01 * jax.random.normal(ks[4], (hid,), jnp.float32)
    w3, b3 = lin(ks[5], hid, out_dim)
    w4, b4 = lin(ks[6], out_dim, 1)
    return (w1, b1, w2, b2, coefs, eq_b, eq_db, w3, b3, w4, b4)


if __name__ == "__main__":
    B, n, in_dim, hid, out_dim = 2, 8, 4, 32, 16

    key = jax.random.PRNGKey(0)
    kx, kp = jax.random.split(key)
    x = jax.random.normal(kx, (B, n, in_dim), jnp.float32)
    params = init_params(kp, in_dim, hid, out_dim)

    out_kernel = jax.block_until_ready(unique_eq2_forward(x, params))

    # Gold reference at highest matmul precision; kernel matmuls run at native
    # MXU precision (bf16 passes, f32 accumulation), hence the 2e-2 tolerance.
    with jax.default_matmul_precision("highest"):
        out_ref = jax.block_until_ready(ref_forward(x, params))

    err = float(jnp.max(jnp.abs(out_kernel - out_ref)))
    scale = float(jnp.maximum(jnp.max(jnp.abs(out_ref)), 1.0))
    assert out_kernel.shape == (B, 1), out_kernel.shape
    assert err / scale < 2e-2, f"mismatch: max abs err {err} (ref scale {scale})"
    print("KERNEL_OK")
</pallas_src>

<mosaic_0001>
module attributes {stable_mosaic.version = 11 : i64} {
  func.func @unique_eq2_kernel(%arg0: i32, %arg1: memref<2x8x4xf32, #tpu.memory_space<vmem>>, %arg2: memref<4x32xf32, #tpu.memory_space<vmem>>, %arg3: memref<1x32xf32, #tpu.memory_space<vmem>>, %arg4: memref<32x32xf32, #tpu.memory_space<vmem>>, %arg5: memref<1x32xf32, #tpu.memory_space<vmem>>, %arg6: memref<32x32xf32, #tpu.memory_space<vmem>>, %arg7: memref<6x32x32xf32, #tpu.memory_space<vmem>>, %arg8: memref<4x32x32xf32, #tpu.memory_space<vmem>>, %arg9: memref<1x32xf32, #tpu.memory_space<vmem>>, %arg10: memref<1x32xf32, #tpu.memory_space<vmem>>, %arg11: memref<32x16xf32, #tpu.memory_space<vmem>>, %arg12: memref<1x16xf32, #tpu.memory_space<vmem>>, %arg13: memref<16x1xf32, #tpu.memory_space<vmem>>, %arg14: memref<1x1xf32, #tpu.memory_space<vmem>>, %arg15: memref<1x2x1xf32, #tpu.memory_space<vmem>>) attributes {dimension_semantics = [#tpu.dimension_semantics<parallel>], iteration_bounds = array<i64: 1>, scalar_prefetch = 0 : i64, scratch_operands = 0 : i64, tpu.core_type = #tpu.core_type<tc>, window_params = [{transform_indices = @transform_0, window_bounds = array<i64: 2, 8, 4>}, {pipeline_mode = #tpu.pipeline_mode<synchronous>, transform_indices = @transform_1, window_bounds = array<i64: 4, 32>}, {pipeline_mode = #tpu.pipeline_mode<synchronous>, transform_indices = @transform_2, window_bounds = array<i64: 1, 32>}, {pipeline_mode = #tpu.pipeline_mode<synchronous>, transform_indices = @transform_3, window_bounds = array<i64: 32, 32>}, {pipeline_mode = #tpu.pipeline_mode<synchronous>, transform_indices = @transform_4, window_bounds = array<i64: 1, 32>}, {pipeline_mode = #tpu.pipeline_mode<synchronous>, transform_indices = @transform_5, window_bounds = array<i64: 32, 32>}, {pipeline_mode = #tpu.pipeline_mode<synchronous>, transform_indices = @transform_6, window_bounds = array<i64: 6, 32, 32>}, {pipeline_mode = #tpu.pipeline_mode<synchronous>, transform_indices = @transform_7, window_bounds = array<i64: 4, 32, 32>}, {pipeline_mode = #tpu.pipeline_mode<synchronous>, transform_indices = @transform_8, window_bounds = array<i64: 1, 32>}, {pipeline_mode = #tpu.pipeline_mode<synchronous>, transform_indices = @transform_9, window_bounds = array<i64: 1, 32>}, {pipeline_mode = #tpu.pipeline_mode<synchronous>, transform_indices = @transform_10, window_bounds = array<i64: 32, 16>}, {pipeline_mode = #tpu.pipeline_mode<synchronous>, transform_indices = @transform_11, window_bounds = array<i64: 1, 16>}, {pipeline_mode = #tpu.pipeline_mode<synchronous>, transform_indices = @transform_12, window_bounds = array<i64: 16, 1>}, {pipeline_mode = #tpu.pipeline_mode<synchronous>, transform_indices = @transform_13, window_bounds = array<i64: 1, 1>}, {transform_indices = @transform_14, window_bounds = array<i64: 1, 2, 1>}]} {
    %c0 = arith.constant 0 : index
    %c0_0 = arith.constant 0 : index
    %c0_1 = arith.constant 0 : index
    %0 = vector.load %arg1[%c0, %c0_0, %c0_1] : memref<2x8x4xf32, #tpu.memory_space<vmem>>, vector<2x8x4xf32>
    %1 = vector.shape_cast %0 : vector<2x8x4xf32> to vector<16x4xf32>
    %c0_2 = arith.constant 0 : index
    %c0_3 = arith.constant 0 : index
    %2 = vector.load %arg2[%c0_2, %c0_3] : memref<4x32xf32, #tpu.memory_space<vmem>>, vector<4x32xf32>
    %cst = arith.constant dense<0.000000e+00> : vector<16x32xf32>
    %3 = tpu.matmul %1, %2, %cst {dimension_numbers = #tpu.dot_dimension_numbers<[1], [0], [0], [1], [0, 0, 1, 1], [], []>} : vector<16x4xf32>, vector<4x32xf32>, vector<16x32xf32> -> vector<16x32xf32>
    %c0_4 = arith.constant 0 : index
    %c0_5 = arith.constant 0 : index
    %4 = vector.load %arg3[%c0_4, %c0_5] : memref<1x32xf32, #tpu.memory_space<vmem>>, vector<1x32xf32>
    %5 = vector.broadcast %4 : vector<1x32xf32> to vector<16x32xf32>
    %6 = arith.addf %3, %5 : vector<16x32xf32>
    %cst_6 = arith.constant 0.000000e+00 : f32
    %7 = vector.broadcast %cst_6 : f32 to vector<16x32xf32>
    %8 = arith.maximumf %6, %7 : vector<16x32xf32>
    %c0_7 = arith.constant 0 : index
    %c0_8 = arith.constant 0 : index
    %9 = vector.load %arg4[%c0_7, %c0_8] : memref<32x32xf32, #tpu.memory_space<vmem>>, vector<32x32xf32>
    %cst_9 = arith.constant dense<0.000000e+00> : vector<16x32xf32>
    %10 = tpu.matmul %8, %9, %cst_9 {dimension_numbers = #tpu.dot_dimension_numbers<[1], [0], [0], [1], [0, 0, 1, 1], [], []>} : vector<16x32xf32>, vector<32x32xf32>, vector<16x32xf32> -> vector<16x32xf32>
    %c0_10 = arith.constant 0 : index
    %c0_11 = arith.constant 0 : index
    %11 = vector.load %arg5[%c0_10, %c0_11] : memref<1x32xf32, #tpu.memory_space<vmem>>, vector<1x32xf32>
    %12 = vector.broadcast %11 : vector<1x32xf32> to vector<16x32xf32>
    %13 = arith.addf %10, %12 : vector<16x32xf32>
    %cst_12 = arith.constant 0.000000e+00 : f32
    %14 = vector.broadcast %cst_12 : f32 to vector<16x32xf32>
    %15 = arith.maximumf %13, %14 : vector<16x32xf32>
    %16 = vector.shape_cast %15 : vector<16x32xf32> to vector<2x8x32xf32>
    %17 = arith.mulf %15, %15 : vector<16x32xf32>
    %cst_13 = arith.constant dense<0.000000e+00> : vector<2x32xf32>
    %18 = vector.multi_reduction <add>, %16, %cst_13 [1] : vector<2x8x32xf32> to vector<2x32xf32>
    %19 = vector.shape_cast %18 : vector<2x32xf32> to vector<2x1x32xf32>
    %20 = vector.broadcast %19 : vector<2x1x32xf32> to vector<2x8x32xf32>
    %21 = arith.mulf %16, %20 : vector<2x8x32xf32>
    %22 = vector.shape_cast %21 : vector<2x8x32xf32> to vector<16x32xf32>
    %23 = vector.shape_cast %17 : vector<16x32xf32> to vector<2x8x32xf32>
    %cst_14 = arith.constant dense<0.000000e+00> : vector<2x32xf32>
    %24 = vector.multi_reduction <add>, %23, %cst_14 [1] : vector<2x8x32xf32> to vector<2x32xf32>
    %25 = arith.mulf %18, %18 : vector<2x32xf32>
    %c0_15 = arith.constant 0 : index
    %c0_16 = arith.constant 0 : index
    %c0_17 = arith.constant 0 : index
    %26 = vector.load %arg7[%c0_15, %c0_16, %c0_17] : memref<6x32x32xf32, #tpu.memory_space<vmem>>, vector<1x32x32xf32>
    %27 = vector.shape_cast %26 : vector<1x32x32xf32> to vector<32x32xf32>
    %cst_18 = arith.constant dense<0.000000e+00> : vector<16x32xf32>
    %28 = tpu.matmul %22, %27, %cst_18 {dimension_numbers = #tpu.dot_dimension_numbers<[1], [0], [0], [1], [0, 0, 1, 1], [], []>} : vector<16x32xf32>, vector<32x32xf32>, vector<16x32xf32> -> vector<16x32xf32>
    %c1 = arith.constant 1 : index
    %c0_19 = arith.constant 0 : index
    %c0_20 = arith.constant 0 : index
    %29 = vector.load %arg7[%c1, %c0_19, %c0_20] : memref<6x32x32xf32, #tpu.memory_space<vmem>>, vector<1x32x32xf32>
    %30 = vector.shape_cast %29 : vector<1x32x32xf32> to vector<32x32xf32>
    %cst_21 = arith.constant dense<0.000000e+00> : vector<16x32xf32>
    %31 = tpu.matmul %17, %30, %cst_21 {dimension_numbers = #tpu.dot_dimension_numbers<[1], [0], [0], [1], [0, 0, 1, 1], [], []>} : vector<16x32xf32>, vector<32x32xf32>, vector<16x32xf32> -> vector<16x32xf32>
    %32 = arith.addf %28, %31 : vector<16x32xf32>
    %c2 = arith.constant 2 : index
    %c0_22 = arith.constant 0 : index
    %c0_23 = arith.constant 0 : index
    %33 = vector.load %arg7[%c2, %c0_22, %c0_23] : memref<6x32x32xf32, #tpu.memory_space<vmem>>, vector<1x32x32xf32>
    %34 = vector.shape_cast %33 : vector<1x32x32xf32> to vector<32x32xf32>
    %cst_24 = arith.constant dense<0.000000e+00> : vector<16x32xf32>
    %35 = tpu.matmul %22, %34, %cst_24 {dimension_numbers = #tpu.dot_dimension_numbers<[1], [0], [0], [1], [0, 0, 1, 1], [], []>} : vector<16x32xf32>, vector<32x32xf32>, vector<16x32xf32> -> vector<16x32xf32>
    %c3 = arith.constant 3 : index
    %c0_25 = arith.constant 0 : index
    %c0_26 = arith.constant 0 : index
    %36 = vector.load %arg7[%c3, %c0_25, %c0_26] : memref<6x32x32xf32, #tpu.memory_space<vmem>>, vector<1x32x32xf32>
    %37 = vector.shape_cast %36 : vector<1x32x32xf32> to vector<32x32xf32>
    %cst_27 = arith.constant dense<0.000000e+00> : vector<16x32xf32>
    %38 = tpu.matmul %17, %37, %cst_27 {dimension_numbers = #tpu.dot_dimension_numbers<[1], [0], [0], [1], [0, 0, 1, 1], [], []>} : vector<16x32xf32>, vector<32x32xf32>, vector<16x32xf32> -> vector<16x32xf32>
    %39 = arith.addf %35, %38 : vector<16x32xf32>
    %c4 = arith.constant 4 : index
    %c0_28 = arith.constant 0 : index
    %c0_29 = arith.constant 0 : index
    %40 = vector.load %arg7[%c4, %c0_28, %c0_29] : memref<6x32x32xf32, #tpu.memory_space<vmem>>, vector<1x32x32xf32>
    %41 = vector.shape_cast %40 : vector<1x32x32xf32> to vector<32x32xf32>
    %cst_30 = arith.constant dense<0.000000e+00> : vector<16x32xf32>
    %42 = tpu.matmul %22, %41, %cst_30 {dimension_numbers = #tpu.dot_dimension_numbers<[1], [0], [0], [1], [0, 0, 1, 1], [], []>} : vector<16x32xf32>, vector<32x32xf32>, vector<16x32xf32> -> vector<16x32xf32>
    %c5 = arith.constant 5 : index
    %c0_31 = arith.constant 0 : index
    %c0_32 = arith.constant 0 : index
    %43 = vector.load %arg7[%c5, %c0_31, %c0_32] : memref<6x32x32xf32, #tpu.memory_space<vmem>>, vector<1x32x32xf32>
    %44 = vector.shape_cast %43 : vector<1x32x32xf32> to vector<32x32xf32>
    %cst_33 = arith.constant dense<0.000000e+00> : vector<16x32xf32>
    %45 = tpu.matmul %17, %44, %cst_33 {dimension_numbers = #tpu.dot_dimension_numbers<[1], [0], [0], [1], [0, 0, 1, 1], [], []>} : vector<16x32xf32>, vector<32x32xf32>, vector<16x32xf32> -> vector<16x32xf32>
    %46 = arith.addf %42, %45 : vector<16x32xf32>
    %c0_34 = arith.constant 0 : index
    %c0_35 = arith.constant 0 : index
    %c0_36 = arith.constant 0 : index
    %47 = vector.load %arg8[%c0_34, %c0_35, %c0_36] : memref<4x32x32xf32, #tpu.memory_space<vmem>>, vector<1x32x32xf32>
    %48 = vector.shape_cast %47 : vector<1x32x32xf32> to vector<32x32xf32>
    %cst_37 = arith.constant dense<0.000000e+00> : vector<2x32xf32>
    %49 = tpu.matmul %24, %48, %cst_37 {dimension_numbers = #tpu.dot_dimension_numbers<[1], [0], [0], [1], [0, 0, 1, 1], [], []>} : vector<2x32xf32>, vector<32x32xf32>, vector<2x32xf32> -> vector<2x32xf32>
    %c1_38 = arith.constant 1 : index
    %c0_39 = arith.constant 0 : index
    %c0_40 = arith.constant 0 : index
    %50 = vector.load %arg8[%c1_38, %c0_39, %c0_40] : memref<4x32x32xf32, #tpu.memory_space<vmem>>, vector<1x32x32xf32>
    %51 = vector.shape_cast %50 : vector<1x32x32xf32> to vector<32x32xf32>
    %cst_41 = arith.constant dense<0.000000e+00> : vector<2x32xf32>
    %52 = tpu.matmul %25, %51, %cst_41 {dimension_numbers = #tpu.dot_dimension_numbers<[1], [0], [0], [1], [0, 0, 1, 1], [], []>} : vector<2x32xf32>, vector<32x32xf32>, vector<2x32xf32> -> vector<2x32xf32>
    %53 = arith.addf %49, %52 : vector<2x32xf32>
    %c2_42 = arith.constant 2 : index
    %c0_43 = arith.constant 0 : index
    %c0_44 = arith.constant 0 : index
    %54 = vector.load %arg8[%c2_42, %c0_43, %c0_44] : memref<4x32x32xf32, #tpu.memory_space<vmem>>, vector<1x32x32xf32>
    %55 = vector.shape_cast %54 : vector<1x32x32xf32> to vector<32x32xf32>
    %cst_45 = arith.constant dense<0.000000e+00> : vector<2x32xf32>
    %56 = tpu.matmul %24, %55, %cst_45 {dimension_numbers = #tpu.dot_dimension_numbers<[1], [0], [0], [1], [0, 0, 1, 1], [], []>} : vector<2x32xf32>, vector<32x32xf32>, vector<2x32xf32> -> vector<2x32xf32>
    %c3_46 = arith.constant 3 : index
    %c0_47 = arith.constant 0 : index
    %c0_48 = arith.constant 0 : index
    %57 = vector.load %arg8[%c3_46, %c0_47, %c0_48] : memref<4x32x32xf32, #tpu.memory_space<vmem>>, vector<1x32x32xf32>
    %58 = vector.shape_cast %57 : vector<1x32x32xf32> to vector<32x32xf32>
    %cst_49 = arith.constant dense<0.000000e+00> : vector<2x32xf32>
    %59 = tpu.matmul %25, %58, %cst_49 {dimension_numbers = #tpu.dot_dimension_numbers<[1], [0], [0], [1], [0, 0, 1, 1], [], []>} : vector<2x32xf32>, vector<32x32xf32>, vector<2x32xf32> -> vector<2x32xf32>
    %60 = arith.addf %56, %59 : vector<2x32xf32>
    %61 = vector.shape_cast %16 : vector<2x8x32xf32> to vector<2x8x1x32xf32>
    %62 = vector.shape_cast %16 : vector<2x8x32xf32> to vector<2x1x8x32xf32>
    %63 = vector.broadcast %61 : vector<2x8x1x32xf32> to vector<2x8x8x32xf32>
    %64 = vector.broadcast %62 : vector<2x1x8x32xf32> to vector<2x8x8x32xf32>
    %65 = arith.mulf %63, %64 : vector<2x8x8x32xf32>
    %66 = vector.shape_cast %65 : vector<2x8x8x32xf32> to vector<128x32xf32>
    %c0_50 = arith.constant 0 : index
    %c0_51 = arith.constant 0 : index
    %67 = vector.load %arg6[%c0_50, %c0_51] : memref<32x32xf32, #tpu.memory_space<vmem>>, vector<32x32xf32>
    %cst_52 = arith.constant dense<0.000000e+00> : vector<128x32xf32>
    %68 = tpu.matmul %66, %67, %cst_52 {dimension_numbers = #tpu.dot_dimension_numbers<[1], [0], [0], [1], [0, 0, 1, 1], [], []>} : vector<128x32xf32>, vector<32x32xf32>, vector<128x32xf32> -> vector<128x32xf32>
    %69 = vector.shape_cast %68 : vector<128x32xf32> to vector<2x8x8x32xf32>
    %70 = tpu.iota {dimensions = array<i32: 0>} : vector<8x8xi32>
    %71 = tpu.iota {dimensions = array<i32: 1>} : vector<8x8xi32>
    %72 = arith.cmpi eq, %70, %71 : vector<8x8xi32>
    %73 = arith.extui %72 : vector<8x8xi1> to vector<8x8xi32>
    %74 = arith.sitofp %73 : vector<8x8xi32> to vector<8x8xf32>
    %75 = vector.shape_cast %74 : vector<8x8xf32> to vector<1x8x8x1xf32>
    %76 = vector.shape_cast %46 : vector<16x32xf32> to vector<2x8x32xf32>
    %77 = vector.shape_cast %53 : vector<2x32xf32> to vector<2x1x32xf32>
    %78 = vector.broadcast %77 : vector<2x1x32xf32> to vector<2x8x32xf32>
    %79 = arith.addf %76, %78 : vector<2x8x32xf32>
    %c0_53 = arith.constant 0 : index
    %c0_54 = arith.constant 0 : index
    %80 = vector.load %arg10[%c0_53, %c0_54] : memref<1x32xf32, #tpu.memory_space<vmem>>, vector<1x32xf32>
    %81 = vector.shape_cast %80 : vector<1x32xf32> to vector<1x1x32xf32>
    %82 = vector.broadcast %81 : vector<1x1x32xf32> to vector<2x8x32xf32>
    %83 = arith.addf %79, %82 : vector<2x8x32xf32>
    %84 = vector.shape_cast %32 : vector<16x32xf32> to vector<2x8x1x32xf32>
    %85 = vector.broadcast %84 : vector<2x8x1x32xf32> to vector<2x8x8x32xf32>
    %86 = arith.addf %69, %85 : vector<2x8x8x32xf32>
    %87 = vector.shape_cast %39 : vector<16x32xf32> to vector<2x1x8x32xf32>
    %88 = vector.broadcast %87 : vector<2x1x8x32xf32> to vector<2x8x8x32xf32>
    %89 = arith.addf %86, %88 : vector<2x8x8x32xf32>
    %c0_55 = arith.constant 0 : index
    %c0_56 = arith.constant 0 : index
    %90 = vector.load %arg9[%c0_55, %c0_56] : memref<1x32xf32, #tpu.memory_space<vmem>>, vector<1x32xf32>
    %91 = vector.broadcast %90 : vector<1x32xf32> to vector<2x32xf32>
    %92 = arith.addf %60, %91 : vector<2x32xf32>
    %93 = vector.shape_cast %92 : vector<2x32xf32> to vector<2x1x1x32xf32>
    %94 = vector.broadcast %93 : vector<2x1x1x32xf32> to vector<2x8x8x32xf32>
    %95 = arith.addf %89, %94 : vector<2x8x8x32xf32>
    %96 = vector.shape_cast %83 : vector<2x8x32xf32> to vector<2x8x1x32xf32>
    %97 = vector.broadcast %75 : vector<1x8x8x1xf32> to vector<2x8x8x32xf32>
    %98 = vector.broadcast %96 : vector<2x8x1x32xf32> to vector<2x8x8x32xf32>
    %99 = arith.mulf %97, %98 : vector<2x8x8x32xf32>
    %100 = arith.addf %95, %99 : vector<2x8x8x32xf32>
    %cst_57 = arith.constant 0.000000e+00 : f32
    %101 = vector.broadcast %cst_57 : f32 to vector<2x8x8x32xf32>
    %102 = arith.maximumf %100, %101 : vector<2x8x8x32xf32>
    %103 = vector.shape_cast %102 : vector<2x8x8x32xf32> to vector<128x32xf32>
    %c0_58 = arith.constant 0 : index
    %c0_59 = arith.constant 0 : index
    %104 = vector.load %arg11[%c0_58, %c0_59] : memref<32x16xf32, #tpu.memory_space<vmem>>, vector<32x16xf32>
    %cst_60 = arith.constant dense<0.000000e+00> : vector<128x16xf32>
    %105 = tpu.matmul %103, %104, %cst_60 {dimension_numbers = #tpu.dot_dimension_numbers<[1], [0], [0], [1], [0, 0, 1, 1], [], []>} : vector<128x32xf32>, vector<32x16xf32>, vector<128x16xf32> -> vector<128x16xf32>
    %c0_61 = arith.constant 0 : index
    %c0_62 = arith.constant 0 : index
    %106 = vector.load %arg12[%c0_61, %c0_62] : memref<1x16xf32, #tpu.memory_space<vmem>>, vector<1x16xf32>
    %107 = vector.broadcast %106 : vector<1x16xf32> to vector<128x16xf32>
    %108 = arith.addf %105, %107 : vector<128x16xf32>
    %cst_63 = arith.constant 0.000000e+00 : f32
    %109 = vector.broadcast %cst_63 : f32 to vector<128x16xf32>
    %110 = arith.maximumf %108, %109 : vector<128x16xf32>
    %111 = vector.shape_cast %110 : vector<128x16xf32> to vector<2x64x16xf32>
    %cst_64 = arith.constant dense<0.000000e+00> : vector<2x16xf32>
    %112 = vector.multi_reduction <add>, %111, %cst_64 [1] : vector<2x64x16xf32> to vector<2x16xf32>
    %cst_65 = arith.constant 0.000000e+00 : f32
    %113 = vector.broadcast %cst_65 : f32 to vector<2x16xf32>
    %114 = arith.maximumf %112, %113 : vector<2x16xf32>
    %c0_66 = arith.constant 0 : index
    %c0_67 = arith.constant 0 : index
    %115 = vector.load %arg13[%c0_66, %c0_67] : memref<16x1xf32, #tpu.memory_space<vmem>>, vector<16x1xf32>
    %cst_68 = arith.constant dense<0.000000e+00> : vector<2x1xf32>
    %116 = tpu.matmul %114, %115, %cst_68 {dimension_numbers = #tpu.dot_dimension_numbers<[1], [0], [0], [1], [0, 0, 1, 1], [], []>} : vector<2x16xf32>, vector<16x1xf32>, vector<2x1xf32> -> vector<2x1xf32>
    %c0_69 = arith.constant 0 : index
    %c0_70 = arith.constant 0 : index
    %117 = vector.load %arg14[%c0_69, %c0_70] : memref<1x1xf32, #tpu.memory_space<vmem>>, vector<1x1xf32>
    %118 = vector.broadcast %117 : vector<1x1xf32> to vector<2x1xf32>
    %119 = arith.addf %116, %118 : vector<2x1xf32>
    %c0_71 = arith.constant 0 : index
    %c0_72 = arith.constant 0 : index
    %c0_73 = arith.constant 0 : index
    %120 = vector.load %arg15[%c0_71, %c0_72, %c0_73] : memref<1x2x1xf32, #tpu.memory_space<vmem>>, vector<1x2x1xf32>
    %121 = vector.shape_cast %120 : vector<1x2x1xf32> to vector<2x1xf32>
    %122 = vector.shape_cast %119 : vector<2x1xf32> to vector<1x2x1xf32>
    tpu.vector_store %arg15[%c0_71, %c0_72, %c0_73], %122 {strides = array<i32>} : memref<1x2x1xf32, #tpu.memory_space<vmem>>, vector<1x2x1xf32>,
    return
  }
  func.func @transform_0(%arg0: i32) -> (i32, i32, i32) {
    %c0_i32 = arith.constant 0 : i32
    %c0_i32_0 = arith.constant 0 : i32
    %c0_i32_1 = arith.constant 0 : i32
    return %arg0, %c0_i32, %c0_i32_0 : i32, i32, i32
  }
  func.func @transform_1(%arg0: i32) -> (i32, i32) {
    %c0_i32 = arith.constant 0 : i32
    %c0_i32_0 = arith.constant 0 : i32
    %c0_i32_1 = arith.constant 0 : i32
    return %c0_i32, %c0_i32_0 : i32, i32
  }
  func.func @transform_2(%arg0: i32) -> (i32, i32) {
    %c0_i32 = arith.constant 0 : i32
    %c0_i32_0 = arith.constant 0 : i32
    %c0_i32_1 = arith.constant 0 : i32
    return %c0_i32, %c0_i32_0 : i32, i32
  }
  func.func @transform_3(%arg0: i32) -> (i32, i32) {
    %c0_i32 = arith.constant 0 : i32
    %c0_i32_0 = arith.constant 0 : i32
    %c0_i32_1 = arith.constant 0 : i32
    return %c0_i32, %c0_i32_0 : i32, i32
  }
  func.func @transform_4(%arg0: i32) -> (i32, i32) {
    %c0_i32 = arith.constant 0 : i32
    %c0_i32_0 = arith.constant 0 : i32
    %c0_i32_1 = arith.constant 0 : i32
    return %c0_i32, %c0_i32_0 : i32, i32
  }
  func.func @transform_5(%arg0: i32) -> (i32, i32) {
    %c0_i32 = arith.constant 0 : i32
    %c0_i32_0 = arith.constant 0 : i32
    %c0_i32_1 = arith.constant 0 : i32
    return %c0_i32, %c0_i32_0 : i32, i32
  }
  func.func @transform_6(%arg0: i32) -> (i32, i32, i32) {
    %c0_i32 = arith.constant 0 : i32
    %c0_i32_0 = arith.constant 0 : i32
    %c0_i32_1 = arith.constant 0 : i32
    %c0_i32_2 = arith.constant 0 : i32
    return %c0_i32, %c0_i32_0, %c0_i32_1 : i32, i32, i32
  }
  func.func @transform_7(%arg0: i32) -> (i32, i32, i32) {
    %c0_i32 = arith.constant 0 : i32
    %c0_i32_0 = arith.constant 0 : i32
    %c0_i32_1 = arith.constant 0 : i32
    %c0_i32_2 = arith.constant 0 : i32
    return %c0_i32, %c0_i32_0, %c0_i32_1 : i32, i32, i32
  }
  func.func @transform_8(%arg0: i32) -> (i32, i32) {
    %c0_i32 = arith.constant 0 : i32
    %c0_i32_0 = arith.constant 0 : i32
    %c0_i32_1 = arith.constant 0 : i32
    return %c0_i32, %c0_i32_0 : i32, i32
  }
  func.func @transform_9(%arg0: i32) -> (i32, i32) {
    %c0_i32 = arith.constant 0 : i32
    %c0_i32_0 = arith.constant 0 : i32
    %c0_i32_1 = arith.constant 0 : i32
    return %c0_i32, %c0_i32_0 : i32, i32
  }
  func.func @transform_10(%arg0: i32) -> (i32, i32) {
    %c0_i32 = arith.constant 0 : i32
    %c0_i32_0 = arith.constant 0 : i32
    %c0_i32_1 = arith.constant 0 : i32
    return %c0_i32, %c0_i32_0 : i32, i32
  }
  func.func @transform_11(%arg0: i32) -> (i32, i32) {
    %c0_i32 = arith.constant 0 : i32
    %c0_i32_0 = arith.constant 0 : i32
    %c0_i32_1 = arith.constant 0 : i32
    return %c0_i32, %c0_i32_0 : i32, i32
  }
  func.func @transform_12(%arg0: i32) -> (i32, i32) {
    %c0_i32 = arith.constant 0 : i32
    %c0_i32_0 = arith.constant 0 : i32
    %c0_i32_1 = arith.constant 0 : i32
    return %c0_i32, %c0_i32_0 : i32, i32
  }
  func.func @transform_13(%arg0: i32) -> (i32, i32) {
    %c0_i32 = arith.constant 0 : i32
    %c0_i32_0 = arith.constant 0 : i32
    %c0_i32_1 = arith.constant 0 : i32
    return %c0_i32, %c0_i32_0 : i32, i32
  }
  func.func @transform_14(%arg0: i32) -> (i32, i32, i32) {
    %c0_i32 = arith.constant 0 : i32
    %c0_i32_0 = arith.constant 0 : i32
    %c0_i32_1 = arith.constant 0 : i32
    return %arg0, %c0_i32, %c0_i32_0 : i32, i32, i32
  }
}

</mosaic_0001>

<bundles_post_ra>
// kernel: tpu_custom_call.1
= control target key start
LH: loop header
LB: loop body
LE: loop exit
PB: predicated region body
PF: predicated region fallthrough
CT: control target
= control target key end

     0   :  { %s3651_s0 = inlined_call_operand.vmem [shape: f32[2,8,4], index: 0, kind: input, shape index: {}]   ;;  %s3652_s1 = inlined_call_operand.vmem [shape: f32[4,32], index: 1, kind: input, shape index: {}]   ;;  %s3653_s2 = inlined_call_operand.vmem [shape: f32[1,32], index: 2, kind: input, shape index: {}]   ;;  %s3654_s3 = inlined_call_operand.vmem [shape: f32[32,32], index: 3, kind: input, shape index: {}]   ;;  %s3655_s4 = inlined_call_operand.vmem [shape: f32[1,32], index: 4, kind: input, shape index: {}]   ;;  %s3656_s5 = inlined_call_operand.vmem [shape: f32[32,32], index: 5, kind: input, shape index: {}]   ;;  %s3657_s6 = inlined_call_operand.hbm [shape: f32[6,32,32], index: 6, kind: input, shape index: {}]   ;;  %s3658_s7 = inlined_call_operand.hbm [shape: f32[4,32,32], index: 7, kind: input, shape index: {}]   ;;  %s3659_s8 = inlined_call_operand.vmem [shape: f32[1,32], index: 8, kind: input, shape index: {}]   ;;  %s3660_s9 = inlined_call_operand.vmem [shape: f32[1,32], index: 9, kind: input, shape index: {}]   ;;  %s3661_s10 = inlined_call_operand.vmem [shape: f32[32,16], index: 10, kind: input, shape index: {}]   ;;  %s3662_s11 = inlined_call_operand.vmem [shape: f32[1,16], index: 11, kind: input, shape index: {}]   ;;  %s3663_s12 = inlined_call_operand.vmem [shape: f32[16,1], index: 12, kind: input, shape index: {}]   ;;  %s3664_s13 = inlined_call_operand.<no memory space> [shape: f32[1,1], index: 13, kind: input, shape index: {}]   ;;  %s3665_s14 = inlined_call_operand.vmem [shape: f32[1,2,1], index: 14, kind: output, shape index: {}]  }
   0x1   :  { %v19_v0 = vstv %s3664_s13 }
   0x2   :  { %20 = vst [vmem:[#allocation2] sm:$0x1] %v19_v0 }
   0x3   :  { %21 = vsyncpa [#allocation4], 0 }
   0x4   :  { %22 = vsyncpa [#allocation6], 0  ;;  %s2988_s15 = smov [#allocation3]   ;;  %s2940_s19 = scalar_lea.hbm %s3657_s6, 3072 }
   0x5   :  { %s40_s16 = sshll.u32 %s2988_s15, 4  ;;  %p2941_p0 = scmp.ne.s32.totalorder %s3657_s6, %s2940_s19  ;;  %s41_s16 = int_to_ptr.vmem [resolvable:$true] %s40_s16 }
   0x6   :  { %p2944_p1 = scmp.lt.u32.totalorder %s2940_s19, %s3657_s6 }
   0x8   :  { %p2946_p2 = pnand %p2944_p1, %p2941_p0 }
   0xa   :  { %2949 = shalt.err (!%p2946_p2)
}
   0xb   :  { %s2950_s13 = scalar_lea.vmem %s41_s16, 3072  ;;  %p2955_p4 = scmp.lt.s32.totalorder %s41_s16, %s41_s16 }
   0xc   :  { %p2951_p3 = scmp.ne.s32.totalorder %s41_s16, %s2950_s13  ;;  %p2956_p5 = scmp.lt.s32.totalorder %s2950_s13, %s2950_s13 }
   0xe   :  { %p2957_p6 = por %p2956_p5, %p2955_p4 }
  0x10   :  { %p2958_p7 = pnand %p2957_p6, %p2951_p3 }
  0x12   :  { %2961 = shalt.err (!%p2958_p7)
}
  0x13   :  { %s2989_s24 = smov 128   ;;  %s2990_s25 = smov 8  }
  0x14   :  { %46 = dma.hbm_to_vmem [thread:$0]  %s3657_s6, 3072, %s41_s16, [#allocation4], %s2989_s24, %s2989_s24, %s2990_s25  }
  0x15   :  { %s2991_s28 = smov [#allocation5]   ;;  %s2962_s17 = scalar_lea.hbm %s3658_s7, 2048 }
  0x16   :  { %s52_s29 = sshll.u32 %s2991_s28, 4  ;;  %p2963_p8 = scmp.ne.s32.totalorder %s3658_s7, %s2962_s17  ;;  %s53_s29 = int_to_ptr.vmem [resolvable:$true] %s52_s29 }
  0x17   :  { %p2966_p9 = scmp.lt.u32.totalorder %s2962_s17, %s3658_s7 }
  0x19   :  { %p2968_p10 = pnand %p2966_p9, %p2963_p8 }
  0x1b   :  { %2971 = shalt.err (!%p2968_p10)
}
  0x1c   :  { %s2972_s22 = scalar_lea.vmem %s53_s29, 2048  ;;  %p2977_p12 = scmp.lt.s32.totalorder %s53_s29, %s53_s29 }
  0x1d   :  { %p2973_p11 = scmp.ne.s32.totalorder %s53_s29, %s2972_s22  ;;  %p2978_p13 = scmp.lt.s32.totalorder %s2972_s22, %s2972_s22 }
  0x1f   :  { %p2979_p0 = por %p2978_p13, %p2977_p12 }
  0x21   :  { %p2980_p1 = pnand %p2979_p0, %p2973_p11 }
  0x23   :  { %2983 = shalt.err (!%p2980_p1)
}
  0x24   :  { %58 = dma.hbm_to_vmem [thread:$0]  %s3658_s7, 2048, %s53_s29, [#allocation6], %s2989_s24, %s2989_s24, %s2990_s25  }
  0x25   :  { %2984 = dma.done.wait [#allocation4], 3072  }
  0x26   :  { %2985 = vsyncadd [#allocation4], 4294964224 }
  0x27   :  { %2986 = dma.done.wait [#allocation6], 2048  }
  0x28   :  { %2987 = vsyncadd [#allocation6], 4294965248  ;;  %vm94_vm0 = vcmask 1043456   ;;  %vm87_vm1 = vcmask 31744   ;;  %v79_v1 = vld [vmem:[%s3652_s1] sm:$0xf]  ;;  %v1111_v35 = vlaneseq }
  0x29   :  { %v77_v2 = vld [vmem:[%s3651_s0] sm:$0xff]  ;;  %v78_v3 = vld [vmem:[%s3651_s0 + $0x8] sm:$0xff]  ;;  %2628 = vmatprep.subr.msk.mxu0 %vm94_vm0, %v79_v1  ;;  %v177_v7 = vld [vmem:[%s3654_s3 + $0x10] sm:$0xff]  ;;  %vm186_vm2 = vcmask 261120   ;;  %v2992_v42 = vmov 0.0   ;;  %vm806_vm4 = vcmask 1041409  }
  0x2a   :  { %2630 = vmatprep.mubr.msk.f32.mxu0 %vm87_vm1, %v77_v2  ;;  %v175_v4 = vld [vmem:[%s3654_s3] sm:$0xff]  ;;  %v176_v5 = vld [vmem:[%s3654_s3 + $0x8] sm:$0xff]  ;;  %2629 = vmatpush3.msk.msra.mxu0 %vm94_vm0, %v79_v1  ;;  %v178_v8 = vld [vmem:[%s3654_s3 + $0x18] sm:$0xff]  ;;  %v3130_v36 = vshrl.u32 %v1111_v35, 7  ;;  %v1501_v37 = vand.u32 127, %v1111_v35  ;;  %vm2995_vm5 = vmmov 0  }
  0x2b   :  { %v2825_v6 = vpack.c.bf16 %v176_v5, %v175_v4  ;;  %2631 = vmatmul.mubr.msk.f32.vlgmr.msra.gmra.mrb[0].mxu0 %vm87_vm1, %v78_v3  ;;  %v2829_v9 = vpack.c.bf16 %v178_v8, %v177_v7  ;;  %v2459_v10 = vld [vmem:[%s3653_s2] ss:$0 sm:$0xff]  ;;  %v309_v17 = vld [vmem:[#allocation3 + $0x20] sm:$0xff]  ;;  %v310_v18 = vld [vmem:[#allocation3 + $0x28] sm:$0xff]  ;;  %v2993_v5 = vmov 1966171168  }
  0x2c   :  { %v481_v19 = vld [vmem:[#allocation3 + $0x60] sm:$0xff]  ;;  %v2833_v20 = vpack.c.bf16 %v310_v18, %v309_v17  ;;  %v482_v21 = vld [vmem:[#allocation3 + $0x68] sm:$0xff]  ;;  %v311_v23 = vld [vmem:[#allocation3 + $0x30] sm:$0xff]  ;;  %v1521_v38 = vsub.s32 2, %v3130_v36  ;;  %v3134_v39 = vsub.s32 0, %v3130_v36  ;;  %vm1502_vm3 = vcmp.eq.s32.totalorder %v3130_v36, %v1501_v37 }
  0x2d   :  { %2826 = vmatprep.subr.bf16.mxu1 %v2825_v6  ;;  %v2849_v22 = vpack.c.bf16 %v482_v21, %v481_v19  ;;  %v312_v24 = vld [vmem:[#allocation3 + $0x38] sm:$0xff]  ;;  %v483_v25 = vld [vmem:[#allocation3 + $0x70] sm:$0xff]  ;;  %v304_v29 = vld [vmem:[#allocation3] sm:$0xff]  ;;  %v1514_v40 = vsub.s32 1, %v3130_v36  ;;  %v1528_v41 = vsub.s32 3, %v3130_v36  ;;  %v2498_v43 = vsel %vm1502_vm3, 1.0, %v2992_v42 }
  0x2e   :  { %2828 = vmatpush3.bf16.msra.mxu1 %v2825_v6  ;;  %2834 = vmatprep.subr.bf16.mxu0 %v2833_v20  ;;  %v2837_v26 = vpack.c.bf16 %v312_v24, %v311_v23  ;;  %v484_v27 = vld [vmem:[#allocation3 + $0x78] sm:$0xff]  ;;  %v305_v30 = vld [vmem:[#allocation3 + $0x8] sm:$0xff]  ;;  %v476_v31 = vld [vmem:[#allocation3 + $0x40] sm:$0xff]  ;;  %v1508_v44 = vrot.slane %v2498_v43, %v3134_v39  ;;  %v1522_v45 = vrot.slane %v2498_v43, %v1521_v38  ;;  %v1535_v48 = vsub.s32 4, %v3130_v36 }
  0x2f   :  { %2830 = vmatprep.subr.bf16.mxu1 %v2829_v9  ;;  %2836 = vmatpush3.bf16.msra.mxu0 %v2833_v20  ;;  %v2853_v28 = vpack.c.bf16 %v484_v27, %v483_v25  ;;  %v3124_v32 = vpack.c.bf16 %v305_v30, %v304_v29  ;;  %v477_v33 = vld [vmem:[#allocation3 + $0x48] sm:$0xff]  ;;  %v1515_v46 = vrot.slane %v2498_v43, %v1514_v40  ;;  %v1542_v49 = vsub.s32 5, %v3130_v36  ;;  %v2463_v56 = vld [vmem:[%s3655_s4] ss:$0 sm:$0xff]  ;;  %v306_v62 = vld [vmem:[#allocation3 + $0x10] sm:$0xff] }
  0x30   :  { %2838 = vmatprep.subr.bf16.mxu0 %v2837_v26  ;;  %v3126_v34 = vpack.c.bf16 %v477_v33, %v476_v31  ;;  %1510 = vbcast.lane.b32.xlu0 %v1508_v44, 256  ;;  %v1529_v47 = vrot.slane %v2498_v43, %v1528_v41  ;;  %v1536_v50 = vrot.slane %v2498_v43, %v1535_v48  ;;  %v1549_v52 = vsub.s32 6, %v3130_v36  ;;  %v307_v0 = vld [vmem:[#allocation3 + $0x18] sm:$0xff]  ;;  %v478_v1 = vld [vmem:[#allocation3 + $0x50] sm:$0xff]  ;;  %v800_v37 = vld [vmem:[#allocation5 + $0x20] sm:$0xff] }
  0x31   :  { %1524 = vbcast.lane.b32.xlu1 %v1522_v45, 256  ;;  %v1543_v51 = vrot.slane %v2498_v43, %v1542_v49  ;;  %v1556_v53 = vsub.s32 7, %v3130_v36  ;;  %v479_v2 = vld [vmem:[#allocation3 + $0x58] sm:$0xff]  ;;  %v1109_v6 = vunpack.c.l.s4 %v2993_v5  ;;  %v801_v38 = vld [vmem:[#allocation5 + $0x28] sm:$0xff]  ;;  %v643_v45 = vld [vmem:[#allocation3 + $0xb0] sm:$0xff]  ;;  %vm2322_vm6 = vcmask 130048  }
  0x32   :  { %2832 = vmatpush3.bf16.msra.mxu1 %v2829_v9  ;;  %v1550_v54 = vrot.slane %v2498_v43, %v1549_v52  ;;  %v2882_v48 = vpack.c.bf16 %v801_v38, %v800_v37  ;;  %vm2451_vm7 = vcmask 1024  }
  0x33   :  { %2850 = vmatprep.subr.bf16.mxu1 %v2849_v22  ;;  %2840 = vmatpush3.bf16.msra.mxu0 %v2837_v26  ;;  %v1557_v55 = vrot.slane %v2498_v43, %v1556_v53  ;;  %v1110_v21 = vunpack.c.0.s8 %v1109_v6 }
  0x34   :  { %2842 = vmatprep.subr.bf16.mxu0 %v3124_v32  ;;  %1517 = vbcast.lane.b32.xlu0 %v1515_v46, 256  ;;  %v644_v46 = vld [vmem:[#allocation3 + $0xb8] sm:$0xff] }
  0x35   :  { %1531 = vbcast.lane.b32.xlu1 %v1529_v47, 256  ;;  %v3179_v31 = vsub.s32 %v1110_v21, %v3130_v36  ;;  %v798_v21 = vld [vmem:[#allocation5 + $0x18] sm:$0xff] }
  0x38   :  { %1538 = vbcast.lane.b32.xlu0 %v1536_v50, 256 }
  0x39   :  { %1545 = vbcast.lane.b32.xlu1 %v1543_v51, 256 }
  0x3c   :  { %1552 = vbcast.lane.b32.xlu0 %v1550_v54, 256 }
  0x3d   :  { %1559 = vbcast.lane.b32.xlu1 %v1557_v55, 256 }
  0xfe   :  { %v2632_v11 = vpop.f32.mrb[0].mxu0 }
  0xff   :  { %v170_v12 = vadd.f32 %v2632_v11, %v2459_v10  ;;  %v164_v13 = vpop.f32.mrb[1].mxu0  ;;  %v2861_v11 = vpack.c.bf16 %v479_v2, %v478_v1 }
 0x100   :  { %v165_v14 = vadd.f32 %v2459_v10, %v164_v13  ;;  %v2845_v10 = vpack.c.bf16 %v307_v0, %v306_v62 }
 0x101   :  { %v174_v16 = vmax.f32 %v170_v12, 0.0 }
 0x102   :  { %v173_v15 = vmax.f32 %v165_v14, 0.0  ;;  %v641_v14 = vld [vmem:[#allocation3 + $0xa0] sm:$0xff] }
 0x104   :  { %2641 = vmatprep.mubr.msk.f32.mxu1 %vm186_vm2, %v173_v15  ;;  %v642_v15 = vld [vmem:[#allocation3 + $0xa8] sm:$0xff] }
 0x105   :  { %2642 = vmatmul.mubr.msk.f32.vlgmr.msra.gmra.mrb[0].mxu1 %vm186_vm2, %v174_v16  ;;  %v2865_v25 = vpack.c.bf16 %v642_v15, %v641_v14 }
 0x106   :  { %2852 = vmatpush3.bf16.msra.mxu1 %v2849_v22 }
 0x107   :  { %2854 = vmatprep.subr.bf16.mxu1 %v2853_v28 }
 0x10a   :  { %2856 = vmatpush3.bf16.msra.mxu1 %v2853_v28 }
 0x10b   :  { %2858 = vmatprep.subr.bf16.mxu1 %v3126_v34 }
 0x1d8   :  { %v2643_v57 = vpop.f32.mrb[0].mxu1 }
 0x1d9   :  { %v265_v58 = vadd.f32 %v2643_v57, %v2463_v56  ;;  %v259_v59 = vpop.f32.mrb[1].mxu1  ;;  %v802_v57 = vld [vmem:[#allocation5 + $0x30] sm:$0xff] }
 0x1da   :  { %v260_v60 = vadd.f32 %v2463_v56, %v259_v59  ;;  %v2869_v56 = vpack.c.bf16 %v644_v46, %v643_v45  ;;  %v636_v59 = vld [vmem:[#allocation3 + $0x80] sm:$0xff]  ;;  %v958_v45 = vld [vmem:[#allocation5 + $0x50] sm:$0xff]  ;;  %v959_v46 = vld [vmem:[#allocation5 + $0x58] sm:$0xff] }
 0x1db   :  { %v3148_v61 = vmax.f32 %v265_v58, 0.0  ;;  %v803_v58 = vld [vmem:[#allocation5 + $0x38] sm:$0xff] }
 0x1dc   :  { %v3150_v63 = vmax.f32 %v260_v60, 0.0  ;;  %v637_v60 = vld [vmem:[#allocation3 + $0x88] sm:$0xff]  ;;  %v2885_v2 = vpack.c.bf16 %v803_v58, %v802_v57 }
 0x1dd   :  { %v3154_v3 = vmul.f32 %v3148_v61, %v3148_v61  ;;  %v279_v4 = vsel %vm186_vm2, %v3148_v61, 0.0  ;;  %v3184_v36 = vrot.slane %v3148_v61, %v3179_v31  ;;  %v1156_v54 = vcombine.high %v3148_v61, %v3148_v61 }
 0x1de   :  { %v3160_v7 = vmul.f32 %v3150_v63, %v3150_v63  ;;  %v272_v8 = vsel %vm186_vm2, %v3150_v63, 0.0  ;;  %v280_v9 = vrot.slane %v279_v4, 4  ;;  %v1114_v37 = vrot.slane %v3150_v63, %v3179_v31 }
 0x1df   :  { %v273_v12 = vrot.slane %v272_v8, 4  ;;  %v295_v13 = vsel %vm186_vm2, %v3154_v3, 0.0  ;;  %v1171_v1 = vcombine.high %v3184_v36, %v3184_v36  ;;  %v1170_v6 = vrot.slane %v1156_v54, %v3179_v31 }
 0x1e0   :  { %2652 = vmatprep.mubr.msk.f32.mxu0 %vm186_vm2, %v3160_v7  ;;  %2674 = vmatprep.mubr.msk.f32.mxu1 %vm186_vm2, %v3160_v7  ;;  %v281_v16 = vadd.f32 %v280_v9, %v279_v4  ;;  %v288_v17 = vsel %vm186_vm2, %v3160_v7, 0.0  ;;  %v296_v18 = vrot.slane %v295_v13, 4  ;;  %v795_v4 = vld [vmem:[#allocation5] sm:$0xff]  ;;  %v796_v9 = vld [vmem:[#allocation5 + $0x8] sm:$0xff]  ;;  %v1107_v54 = vcombine.high %v3150_v63, %v3150_v63 }
 0x1e1   :  { %2653 = vmatmul.mubr.msk.f32.vlgmr.msra.gmra.mrb[2].mxu0 %vm186_vm2, %v3154_v3  ;;  %2675 = vmatmul.mubr.msk.f32.vlgmr.msra.gmra.mrb[2].mxu1 %vm186_vm2, %v3154_v3  ;;  %v274_v19 = vadd.f32 %v273_v12, %v272_v8  ;;  %v289_v20 = vrot.slane %v288_v17, 4  ;;  %v3207_v5 = vrot.slane %v1171_v1, %v3179_v31  ;;  %v2873_v8 = vpack.c.bf16 %v637_v60, %v636_v59 }
 0x1e2   :  { %2844 = vmatpush3.bf16.msra.mxu0 %v3124_v32  ;;  %2860 = vmatpush3.bf16.msra.mxu1 %v3126_v34  ;;  %v282_v22 = vrot.slane %v281_v16, 2  ;;  %v297_v23 = vadd.f32 %v296_v18, %v295_v13  ;;  %v2994_v34 = vmov 0.0|0.0   ;;  %v1186_v13 = vrot.slane %v1170_v6, %v3179_v31 }
 0x1e3   :  { %2846 = vmatprep.subr.bf16.mxu0 %v2845_v10  ;;  %2862 = vmatprep.subr.bf16.mxu1 %v2861_v11  ;;  %v275_v24 = vrot.slane %v274_v19, 2  ;;  %v290_v26 = vadd.f32 %v289_v20, %v288_v17  ;;  %v1203_v12 = vcombine.high %v3207_v5, %v3207_v5  ;;  %v1172_v14 = vcombine.high %v1170_v6, %v1170_v6  ;;  %v797_v20 = vld [vmem:[#allocation5 + $0x10] sm:$0xff] }
 0x1e4   :  { %v283_v27 = vadd.f32 %v282_v22, %v281_v16  ;;  %v298_v28 = vrot.slane %v297_v23, 2  ;;  %v1256_v17 = vrot.slane %v1186_v13, %v3134_v39  ;;  %v1121_v60 = vrot.slane %v1107_v54, %v3179_v31 }
 0x1e5   :  { %v276_v29 = vadd.f32 %v275_v24, %v274_v19  ;;  %v291_v30 = vrot.slane %v290_v26, 2  ;;  %v1252_v16 = vrot.slane %v1203_v12, %v3134_v39  ;;  %v1200_v18 = vrot.slane %v1172_v14, %v3179_v31 }
 0x1e6   :  { %2848 = vmatpush3.bf16.msra.mxu0 %v2845_v10  ;;  %2864 = vmatpush3.bf16.msra.mxu1 %v2861_v11  ;;  %v284_v33 = vrot.slane %v283_v27, 1  ;;  %v299_v32 = vadd.f32 %v298_v28, %v297_v23  ;;  %v638_v10 = vld [vmem:[#allocation3 + $0x90] sm:$0xff]  ;;  %v639_v11 = vld [vmem:[#allocation3 + $0x98] sm:$0xff]  ;;  %v1202_v19 = vcombine.high %v1186_v13, %v1186_v13  ;;  %v3230_v23 = vmul.f32 %v1256_v17, %v3148_v61  ;;  %v961_v28 = vld [vmem:[#allocation5 + $0x60] sm:$0xff] }
 0x1e7   :  { %v277_v35 = vrot.slane %v276_v29, 1  ;;  %2866 = vmatprep.subr.bf16.mxu0 %v2865_v25  ;;  %2881 = vmatprep.subr.bf16.mxu1 %v2994_v34  ;;  %v292_v40 = vadd.f32 %v291_v30, %v290_v26  ;;  %v2877_v15 = vpack.c.bf16 %v639_v11, %v638_v10  ;;  %v3223_v22 = vmul.f32 %v1252_v16, %v3148_v61 }
 0x1e8   :  { %v285_v41 = vadd.f32 %v284_v33, %v283_v27  ;;  %v300_v43 = vrot.slane %v299_v32, 1  ;;  %v1260_v24 = vrot.slane %v1200_v18, %v3134_v39  ;;  %v1204_v26 = vcombine.high %v1200_v18, %v1200_v18  ;;  %v956_v33 = vld [vmem:[#allocation5 + $0x40] sm:$0xff] }
 0x1e9   :  { %v278_v44 = vadd.f32 %v277_v35, %v276_v29  ;;  %v293_v47 = vrot.slane %v292_v40, 1  ;;  %v2891_v27 = vpack.c.bf16 %v798_v21, %v797_v20  ;;  %v962_v29 = vld [vmem:[#allocation5 + $0x68] sm:$0xff]  ;;  %v1137_v10 = vrot.slane %v1121_v60, %v3179_v31 }
 0x1ea   :  { %v303_v49 = vmul.f32 %v285_v41, %v285_v41  ;;  %v301_v50 = vadd.f32 %v300_v43, %v299_v32  ;;  %v3190_v55 = vmul.f32 %v285_v41, %v3148_v61  ;;  %v957_v32 = vld [vmem:[#allocation5 + $0x48] sm:$0xff]  ;;  %v1268_v35 = vrot.slane %v1204_v26, %v3134_v39 }
 0x1eb   :  { %v286_v51 = vmul.f32 %v278_v44, %v3150_v63  ;;  %v302_v52 = vmul.f32 %v278_v44, %v278_v44  ;;  %v294_v53 = vadd.f32 %v293_v47, %v292_v40  ;;  %v2894_v38 = vpack.c.bf16 %v962_v29, %v961_v28  ;;  %v963_v40 = vld [vmem:[#allocation5 + $0x70] sm:$0xff]  ;;  %v964_v44 = vld [vmem:[#allocation5 + $0x78] sm:$0xff] }
 0x1ec   :  { %v3248_v41 = vmul.f32 %v1268_v35, %v3148_v61  ;;  %v2900_v43 = vpack.c.bf16 %v957_v32, %v956_v33  ;;  %v1301_v47 = vld [vmem:[%s3656_s5] sm:$0xff]  ;;  %v1224_v13 = vrot.slane %v1137_v10, %v3134_v39  ;;  %v1153_v14 = vcombine.high %v1137_v10, %v1137_v10 }
 0x1ed   :  { %2663 = vmatprep.mubr.msk.f32.mxu0 %vm186_vm2, %v286_v51  ;;  %2685 = vmatprep.mubr.msk.f32.mxu1 %vm186_vm2, %v286_v51  ;;  %v3195_v62 = vsel %vm806_vm4, %v303_v49, %v302_v52  ;;  %v3198_v0 = vsel %vm806_vm4, %v301_v50, %v294_v53  ;;  %v1130_v49 = vrot.slane %v1114_v37, %v3179_v31 }
 0x1ee   :  { %2664 = vmatmul.mubr.msk.f32.vlgmr.msra.gmra.mrb[2].mxu0 %vm186_vm2, %v3190_v55  ;;  %2686 = vmatmul.mubr.msk.f32.vlgmr.msra.gmra.mrb[2].mxu1 %vm186_vm2, %v3190_v55  ;;  %v2897_v50 = vpack.c.bf16 %v964_v44, %v963_v40  ;;  %v1122_v53 = vcombine.high %v1114_v37, %v1114_v37  ;;  %v1289_v17 = vmul.f32 %v1224_v13, %v3150_v63  ;;  %v2500_v13 = vld [vmem:[%s3659_s8] ss:$0 sm:$0xff] }
 0x1ef   :  { %2868 = vmatpush3.bf16.msra.mxu0 %v2865_v25  ;;  %2883 = vmatpush3.bf16.msra.mxu1 %v2882_v48  ;;  %v1264_v25 = vrot.slane %v1202_v19, %v3134_v39  ;;  %v1302_v48 = vld [vmem:[%s3656_s5 + $0x8] sm:$0xff]  ;;  %v1208_v57 = vrot.slane %v1130_v49, %v3134_v39  ;;  %v1152_v1 = vcombine.high %v1130_v49, %v1130_v49 }
 0x1f0   :  { %2696 = vmatprep.mubr.msk.f32.mxu0 %vm186_vm2, %v3160_v7  ;;  %2870 = vmatprep.subr.bf16.mxu0 %v2869_v56  ;;  %v2888_v7 = vpack.c.bf16 %v796_v9, %v795_v4  ;;  %v2905_v52 = vpack.c.bf16 %v1302_v48, %v1301_v47  ;;  %v1144_v59 = vrot.slane %v1122_v53, %v3179_v31 }
 0x1f1   :  { %2884 = vmatprep.subr.bf16.mxu1 %v2994_v34  ;;  %2718 = vmatprep.mubr.msk.f32.mxu1 %vm2995_vm5, %v2992_v42  ;;  %v3239_v30 = vmul.f32 %v1264_v25, %v3148_v61  ;;  %v1216_v9 = vrot.slane %v1152_v1, %v3134_v39  ;;  %v1232_v18 = vrot.slane %v1153_v14, %v3134_v39 }
 0x1f2   :  { %v1212_v4 = vrot.slane %v1144_v59, %v3134_v39  ;;  %v1154_v6 = vcombine.high %v1144_v59, %v1144_v59 }
 0x1f3   :  { %2872 = vmatpush3.bf16.msra.mxu0 %v2869_v56  ;;  %2886 = vmatpush3.bf16.msra.mxu1 %v2885_v2  ;;  %v1304_v56 = vld [vmem:[%s3656_s5 + $0x18] sm:$0xff]  ;;  %v1285_v2 = vmul.f32 %v1208_v57, %v3150_v63  ;;  %v1291_v21 = vmul.f32 %v1232_v18, %v3150_v63 }
 0x1f4   :  { %2874 = vmatprep.subr.bf16.mxu0 %v2873_v8  ;;  %2887 = vmatprep.subr.bf16.mxu1 %v2994_v34  ;;  %v1220_v11 = vrot.slane %v1154_v6, %v3134_v39 }
 0x1f6   :  { %2697 = vmatmul.mubr.msk.f32.vlgmr.msra.gmra.mrb[4].mxu0 %vm186_vm2, %v3154_v3  ;;  %2719 = vmatmul.mubr.msk.f32.vlgmr.msra.gmra.mrb[4].mxu1 %vm186_vm2, %v3195_v62  ;;  %v3236_v3 = vmul.f32 %v1260_v24, %v3148_v61 }
 0x1f7   :  { %2876 = vmatpush3.bf16.msra.mxu0 %v2873_v8  ;;  %2707 = vmatprep.mubr.msk.f32.mxu0 %vm186_vm2, %v286_v51  ;;  %v2903_v51 = vpack.c.bf16 %v959_v46, %v958_v45  ;;  %v1123_v8 = vcombine.high %v1121_v60, %v1121_v60 }
 0x1f8   :  { %2889 = vmatpush3.bf16.msra.mxu1 %v2888_v7  ;;  %2878 = vmatprep.subr.bf16.mxu0 %v2877_v15  ;;  %v1288_v7 = vmul.f32 %v1220_v11, %v3150_v63 }
 0x1f9   :  { %2890 = vmatprep.subr.bf16.mxu1 %v2994_v34  ;;  %2729 = vmatprep.mubr.msk.f32.mxu1 %vm2995_vm5, %v2992_v42  ;;  %v1151_v12 = vrot.slane %v1123_v8, %v3179_v31 }
 0x1fb   :  { %2880 = vmatpush3.bf16.msra.mxu0 %v2877_v15  ;;  %v1228_v15 = vrot.slane %v1151_v12, %v3134_v39  ;;  %v1155_v16 = vcombine.high %v1151_v12, %v1151_v12 }
 0x1fc   :  { %2892 = vmatpush3.bf16.msra.mxu1 %v2891_v27  ;;  %2893 = vmatprep.subr.bf16.mxu0 %v2994_v34 }
 0x1fd   :  { %2899 = vmatprep.subr.bf16.mxu1 %v2994_v34  ;;  %v1290_v19 = vmul.f32 %v1228_v15, %v3150_v63  ;;  %v1236_v20 = vrot.slane %v1155_v16, %v3134_v39 }
 0x1fe   :  { %2708 = vmatmul.mubr.msk.f32.vlgmr.msra.gmra.mrb[4].mxu0 %vm186_vm2, %v3190_v55  ;;  %v1303_v55 = vld [vmem:[%s3656_s5 + $0x10] sm:$0xff] }
 0x1ff   :  { %2730 = vmatmul.mubr.msk.f32.vlgmr.msra.gmra.mrb[4].mxu1 %vm186_vm2, %v3198_v0  ;;  %2895 = vmatpush3.bf16.msra.mxu0 %v2894_v38  ;;  %v2909_v58 = vpack.c.bf16 %v1304_v56, %v1303_v55  ;;  %v1292_v26 = vmul.f32 %v1236_v20, %v3150_v63 }
 0x200   :  { %2901 = vmatpush3.bf16.msra.mxu1 %v2900_v43  ;;  %2896 = vmatprep.subr.bf16.mxu0 %v2994_v34 }
 0x201   :  { %2902 = vmatprep.subr.bf16.mxu1 %v2994_v34  ;;  %2740 = vmatprep.mubr.msk.f32.mxu0 %vm2995_vm5, %v2992_v42 }
 0x202   :  { %2751 = vmatprep.mubr.msk.f32.mxu1 %vm2995_vm5, %v2992_v42 }
 0x203   :  { %2898 = vmatpush3.bf16.msra.mxu0 %v2897_v50 }
 0x204   :  { %2904 = vmatpush3.bf16.msra.mxu1 %v2903_v51  ;;  %2906 = vmatprep.subr.bf16.mxu0 %v2905_v52 }
 0x206   :  { %2741 = vmatmul.mubr.msk.f32.vlgmr.msra.gmra.mrb[6].mxu0 %vm186_vm2, %v3195_v62  ;;  %v1286_v62 = vmul.f32 %v1212_v4, %v3150_v63  ;;  %v2499_v4 = vld [vmem:[%s3660_s9] ss:$0 sm:$0xff] }
 0x207   :  { %2752 = vmatmul.mubr.msk.f32.vlgmr.msra.gmra.mrb[6].mxu1 %vm186_vm2, %v3198_v0  ;;  %2908 = vmatpush3.bf16.msra.mxu0 %v2905_v52  ;;  %v1287_v0 = vmul.f32 %v1216_v9, %v3150_v63  ;;  %v2103_v63 = vld [vmem:[%s3661_s10 + $0x8] sm:$0xff] }
 0x208   :  { %2762 = vmatprep.mubr.msk.f32.mxu0 %vm186_vm2, %v1285_v2  ;;  %2910 = vmatprep.subr.bf16.mxu0 %v2909_v58 }
 0x20b   :  { %2912 = vmatpush3.bf16.msra.mxu0 %v2909_v58 }
 0x20c   :  { %2921 = vmatprep.subr.bf16.mxu0 %v2994_v34  ;;  %v1179_v34 = vrot.slane %v3184_v36, %v3179_v31  ;;  %v1244_v36 = vrot.slane %v3207_v5, %v3134_v39 }
 0x20e   :  { %2763 = vmatmul.mubr.msk.f32.vlgmr.msra.gmra.mrb[8].mxu0 %vm186_vm2, %v1286_v62  ;;  %v1240_v24 = vrot.slane %v1179_v34, %v3134_v39  ;;  %v1201_v25 = vcombine.high %v1179_v34, %v1179_v34  ;;  %v1294_v29 = vmul.f32 %v1244_v36, %v3148_v61 }
 0x20f   :  { %2765 = vmatprep.mubr.msk.f32.mxu0 %vm186_vm2, %v1287_v0 }
 0x210   :  { %v1293_v27 = vmul.f32 %v1240_v24, %v3148_v61  ;;  %v1248_v28 = vrot.slane %v1201_v25, %v3134_v39 }
 0x212   :  { %2766 = vmatmul.mubr.msk.f32.gmra.mrb[10].mxu0 %vm186_vm2, %v1288_v7  ;;  %v1295_v33 = vmul.f32 %v1248_v28, %v3148_v61  ;;  %v2102_v61 = vld [vmem:[%s3661_s10] sm:$0xff] }
 0x213   :  { %2768 = vmatprep.mubr.msk.f32.mxu0 %vm186_vm2, %v1289_v17  ;;  %v2913_v5 = vpack.c.bf16 %v2103_v63, %v2102_v61 }
 0x215   :  { %2914 = vmatprep.subr.bf16.mxu1 %v2913_v5 }
 0x216   :  { %2769 = vmatmul.mubr.msk.f32.gmra.mrb[12].mxu0 %vm186_vm2, %v1290_v19  ;;  %2916 = vmatpush3.bf16.msra.mxu1 %v2913_v5 }
 0x217   :  { %2771 = vmatprep.mubr.msk.f32.mxu0 %vm186_vm2, %v1291_v21 }
 0x21a   :  { %2772 = vmatmul.mubr.msk.f32.gmra.mrb[14].mxu0 %vm186_vm2, %v1292_v26 }
 0x21b   :  { %2774 = vmatprep.mubr.msk.f32.mxu0 %vm186_vm2, %v1293_v27 }
 0x21e   :  { %2775 = vmatmul.mubr.msk.f32.gmra.mrb[16].mxu0 %vm186_vm2, %v1294_v29 }
 0x21f   :  { %2777 = vmatprep.mubr.msk.f32.mxu0 %vm186_vm2, %v1295_v33 }
 0x222   :  { %2778 = vmatmul.mubr.msk.f32.gmra.mrb[18].mxu0 %vm186_vm2, %v3223_v22  ;;  %v2104_v22 = vld [vmem:[%s3661_s10 + $0x10] sm:$0xff] }
 0x223   :  { %2780 = vmatprep.mubr.msk.f32.mxu0 %vm186_vm2, %v3230_v23  ;;  %v2105_v23 = vld [vmem:[%s3661_s10 + $0x18] sm:$0xff] }
 0x226   :  { %2781 = vmatmul.mubr.msk.f32.gmra.mrb[20].mxu0 %vm186_vm2, %v3236_v3 }
 0x227   :  { %2783 = vmatprep.mubr.msk.f32.mxu0 %vm186_vm2, %v3239_v30 }
 0x22a   :  { %2784 = vmatmul.mubr.msk.f32.gmra.mrb[22].mxu0 %vm186_vm2, %v3248_v41 }
 0x22b   :  { %2822 = vmatprep.mubr.msk.f32.mxu0 %vm2995_vm5, %v2992_v42  ;;  %v2917_v42 = vpack.c.bf16 %v2105_v23, %v2104_v22 }
 0x22d   :  { %2918 = vmatprep.subr.bf16.mxu1 %v2917_v42 }
 0x22e   :  { %2920 = vmatpush3.bf16.msra.mxu1 %v2917_v42 }
 0x2c1   :  { %v2665_v3 = vpop.f32.mrb[2].mxu0  ;;  %v3346_v30 = vpop.f32.mrb[2].mxu1 }
 0x2c2   :  { %v466_v32 = vpop.f32.mrb[3].mxu0  ;;  %v3348_v35 = vpop.f32.mrb[3].mxu1  ;;  %v1663_v37 = vrot.slane %v2665_v3, %v3179_v31  ;;  %v1656_v41 = vcombine.high %v2665_v3, %v2665_v3 }
 0x2c3   :  { %v1614_v38 = vrot.slane %v466_v32, %v3179_v31  ;;  %v1607_v40 = vcombine.high %v466_v32, %v466_v32  ;;  %v1511_v3 = vpop.permute.xlu0 %1510 }
 0x2c4   :  { %v1671_v44 = vcombine.high %v1663_v37, %v1663_v37  ;;  %v3353_v45 = vrot.slane %v1663_v37, %v3179_v31  ;;  %v1670_v52 = vrot.slane %v1656_v41, %v3179_v31  ;;  %v1525_v41 = vpop.permute.xlu1 %1524 }
 0x2c5   :  { %v1622_v46 = vcombine.high %v1614_v38, %v1614_v38  ;;  %v1621_v49 = vrot.slane %v1607_v40, %v3179_v31  ;;  %v3359_v53 = vrot.slane %v1614_v38, %v3179_v31 }
 0x2c6   :  { %v3366_v57 = vrot.slane %v1671_v44, %v3179_v31  ;;  %v1701_v58 = vcombine.high %v3353_v45, %v3353_v45  ;;  %v1672_v2 = vcombine.high %v1670_v52, %v1670_v52  ;;  %v1740_v8 = vrot.slane %v3353_v45, %v3134_v39 }
 0x2c7   :  { %v3363_v56 = vrot.slane %v1622_v46, %v3179_v31  ;;  %v1623_v59 = vcombine.high %v1621_v49, %v1621_v49  ;;  %v1652_v6 = vcombine.high %v3359_v53, %v3359_v53  ;;  %v1708_v11 = vrot.slane %v3359_v53, %v3134_v39 }
 0x2c8   :  { %v3383_v12 = vrot.slane %v1621_v49, %v3179_v31  ;;  %v1744_v15 = vrot.slane %v3366_v57, %v3134_v39  ;;  %v1703_v16 = vcombine.high %v3366_v57, %v3366_v57  ;;  %v3395_v17 = vrot.slane %v1701_v58, %v3134_v39 }
 0x2c9   :  { %v1654_v7 = vcombine.high %v3363_v56, %v3363_v56  ;;  %v3398_v21 = vrot.slane %v1623_v59, %v3179_v31  ;;  %v1712_v24 = vrot.slane %v3363_v56, %v3134_v39  ;;  %v3403_v25 = vrot.slane %v1652_v6, %v3134_v39 }
 0x2ca   :  { %v3406_v26 = vrot.slane %v1672_v2, %v3179_v31  ;;  %v3409_v36 = vrot.slane %v1670_v52, %v3179_v31  ;;  %v1724_v63 = vrot.slane %v3383_v12, %v3134_v39  ;;  %v1653_v5 = vcombine.high %v3383_v12, %v3383_v12 }
 0x2cb   :  { %v3413_v61 = vrot.slane %v1654_v7, %v3134_v39  ;;  %v3420_v22 = vrot.slane %v1703_v16, %v3134_v39  ;;  %v1728_v32 = vrot.slane %v3398_v21, %v3134_v39  ;;  %v1655_v37 = vcombine.high %v3398_v21, %v3398_v21 }
 0x2cc   :  { %v1702_v44 = vcombine.high %v3409_v36, %v3409_v36  ;;  %v3438_v56 = vrot.slane %v1653_v5, %v3134_v39  ;;  %v1760_v6 = vrot.slane %v3406_v26, %v3134_v39 }
 0x2ce   :  { %v3456_v7 = vrot.slane %v1702_v44, %v3134_v39 }
 0x2d1   :  { %v2709_v43 = vpop.f32.mrb[4].mxu0 }
 0x2d2   :  { %v951_v47 = vpop.f32.mrb[4].mxu1  ;;  %v786_v48 = vpop.f32.mrb[5].mxu0 }
 0x2d3   :  { %v1568_v50 = vrot.slane %v951_v47, %v3179_v31  ;;  %v2731_v51 = vpop.f32.mrb[5].mxu1 }
 0x2d5   :  { %v1569_v54 = vcombine.high %v1568_v50, %v1568_v50  ;;  %v1576_v55 = vrot.slane %v1568_v50, %v3179_v31 }
 0x2d7   :  { %v1583_v60 = vrot.slane %v1569_v54, %v3179_v31  ;;  %v1587_v1 = vrot.slane %v1576_v55, %v3134_v39 }
 0x2d9   :  { %v1591_v9 = vrot.slane %v1583_v60, %v3134_v39  ;;  %v1594_v10 = vadd.f32 %v1587_v1, %v786_v48  ;;  %v1031_v62 = vpop.f32.mrb[6].mxu0 }
 0x2da   :  { %v1101_v0 = vpop.f32.mrb[6].mxu1  ;;  %v2742_v14 = vpop.f32.mrb[7].mxu0 }
 0x2db   :  { %v1595_v18 = vadd.f32 %v2709_v43, %v1591_v9  ;;  %v1603_v34 = vadd.f32 %v2499_v4, %v1594_v10  ;;  %v1102_v19 = vadd.f32 %v1101_v0, %v1031_v62  ;;  %v2753_v20 = vpop.f32.mrb[7].mxu1  ;;  %v1704_v43 = vcombine.high %v3406_v26, %v3406_v26  ;;  %v1518_v10 = vpop.permute.xlu0 %1517 }
 0x2dc   :  { %v1756_v9 = vrot.slane %v3409_v36, %v3134_v39 }
 0x2dd   :  { %v1604_v27 = vadd.f32 %v2499_v4, %v1595_v18  ;;  %v1876_v28 = vcombine.high %v1603_v34, %v1603_v34  ;;  %v1883_v29 = vrot.slane %v1603_v34, %v3179_v31  ;;  %v1824_v33 = vadd.f32 %v2500_v13, %v1102_v19  ;;  %v1532_v34 = vpop.permute.xlu1 %1531 }
 0x2de   :  { %v3444_v4 = vrot.slane %v1655_v37, %v3134_v39  ;;  %v3453_v14 = vrot.slane %v1704_v43, %v3134_v39 }
 0x2df   :  { %v1891_v23 = vcombine.high %v1883_v29, %v1883_v29  ;;  %v1932_v42 = vrot.slane %v1604_v27, %v3179_v31  ;;  %v1899_v38 = vrot.slane %v1883_v29, %v3179_v31  ;;  %v1832_v40 = vrot.slane %v1824_v33, %v3179_v31  ;;  %v3479_v53 = vpop.permute.xlu0 %1538 }
 0x2e0   :  { %v1890_v46 = vrot.slane %v1876_v28, %v3179_v31  ;;  %v1925_v51 = vcombine.high %v1604_v27, %v1604_v27 }
 0x2e1   :  { %v1948_v47 = vrot.slane %v1932_v42, %v3179_v31  ;;  %v1913_v48 = vrot.slane %v1891_v23, %v3179_v31  ;;  %v1940_v49 = vcombine.high %v1932_v42, %v1932_v42  ;;  %v2764_v50 = vpop.f32.mrb[8].mxu0  ;;  %v1977_v52 = vrot.slane %v1899_v38, %v3134_v39 }
 0x2e2   :  { %v1833_v54 = vcombine.high %v1832_v40, %v1832_v40  ;;  %v1419_v55 = vpop.f32.mrb[9].mxu0  ;;  %v1840_v59 = vrot.slane %v1832_v40, %v3179_v31  ;;  %v1921_v60 = vcombine.high %v1899_v38, %v1899_v38  ;;  %v1906_v0 = vrot.slane %v1890_v46, %v3179_v31 }
 0x2e3   :  { %v2009_v58 = vrot.slane %v1948_v47, %v3134_v39  ;;  %v1962_v1 = vrot.slane %v1940_v49, %v3179_v31  ;;  %v1970_v2 = vcombine.high %v1948_v47, %v1948_v47  ;;  %v1981_v62 = vrot.slane %v1913_v48, %v3134_v39 }
 0x2e4   :  { %v2054_v16 = vmul.f32 %v1977_v52, %v1511_v3  ;;  %v1847_v18 = vrot.slane %v1833_v54, %v3179_v31  ;;  %v1923_v19 = vcombine.high %v1913_v48, %v1913_v48  ;;  %v3462_v29 = vrot.slane %v1840_v59, %v3134_v39  ;;  %v3487_v59 = vpop.permute.xlu1 %1545 }
 0x2e5   :  { %v2767_v13 = vpop.f32.mrb[10].mxu0  ;;  %v1972_v20 = vcombine.high %v1962_v1, %v1962_v1  ;;  %v3459_v28 = vmul.f32 %v2009_v58, %v1511_v3  ;;  %v1985_v33 = vrot.slane %v1921_v60, %v3134_v39  ;;  %v1939_v5 = vrot.slane %v1925_v51, %v3179_v31 }
 0x2e6   :  { %v1429_v27 = vpop.f32.mrb[11].mxu0  ;;  %v2017_v23 = vrot.slane %v1970_v2, %v3134_v39  ;;  %v2013_v42 = vrot.slane %v1962_v1, %v3134_v39  ;;  %v1786_v37 = vadd.f32 %v2764_v50, %v1712_v24  ;;  %v1785_v38 = vadd.f32 %v1708_v11, %v1419_v55 }
 0x2e7   :  { %v2055_v40 = vmul.f32 %v1981_v62, %v1518_v10  ;;  %v1989_v3 = vrot.slane %v1923_v19, %v3134_v39  ;;  %v1993_v43 = vrot.slane %v1906_v0, %v3134_v39  ;;  %v1892_v44 = vcombine.high %v1890_v46, %v1890_v46 }
 0x2e8   :  { %v3474_v48 = vrot.slane %v1847_v18, %v3134_v39  ;;  %v2021_v49 = vrot.slane %v1972_v20, %v3134_v39  ;;  %v1802_v51 = vadd.f32 %v1786_v37, %v3348_v35  ;;  %v1801_v24 = vadd.f32 %v1785_v38, %v3348_v35 }
 0x2e9   :  { %v2770_v47 = vpop.f32.mrb[12].mxu0  ;;  %v2056_v52 = vmul.f32 %v1985_v33, %v1525_v41  ;;  %v3482_v11 = vrot.slane %v1939_v5, %v3179_v31  ;;  %v1920_v54 = vrot.slane %v1892_v44, %v3179_v31  ;;  %v1941_v46 = vcombine.high %v1939_v5, %v1939_v5 }
 0x2ea   :  { %v1439_v50 = vpop.f32.mrb[13].mxu0  ;;  %v1859_v55 = vadd.f32 %v3462_v29, %v1802_v51  ;;  %v1858_v58 = vadd.f32 %v3462_v29, %v1801_v24  ;;  %v1922_v60 = vcombine.high %v1906_v0, %v1906_v0  ;;  %v1788_v1 = vadd.f32 %v2767_v13, %v3413_v61 }
 0x2eb   :  { %v3490_v2 = vmul.f32 %v2017_v23, %v1525_v41  ;;  %v3492_v62 = vmul.f32 %v2013_v42, %v1518_v10  ;;  %v2057_v18 = vmul.f32 %v1989_v3, %v1532_v34  ;;  %v2058_v19 = vmul.f32 %v1993_v43, %v3479_v53 }
 0x2ec   :  { %v3495_v33 = vmul.f32 %v2021_v49, %v1532_v34  ;;  %v2071_v5 = vadd.f32 %v2055_v40, %v1859_v55  ;;  %v2070_v37 = vadd.f32 %v2054_v16, %v1858_v58  ;;  %v1804_v38 = vadd.f32 %v1788_v1, %v3348_v35  ;;  %v3509_v40 = vpop.permute.xlu0 %1552 }
 0x2ed   :  { %v2773_v20 = vpop.f32.mrb[14].mxu0  ;;  %v2025_v0 = vrot.slane %v3482_v11, %v3134_v39  ;;  %v3501_v61 = vrot.slane %v1941_v46, %v3179_v31  ;;  %v1997_v41 = vrot.slane %v1920_v54, %v3134_v39  ;;  %v1787_v10 = vadd.f32 %v3403_v25, %v1429_v27  ;;  %v3515_v27 = vpop.permute.xlu1 %1559 }
 0x2ee   :  { %v1449_v44 = vpop.f32.mrb[15].mxu0  ;;  %v2086_v13 = vmax.f32 %v2070_v37, 0.0  ;;  %v1971_v34 = vcombine.high %v3482_v11, %v3482_v11  ;;  %v2001_v23 = vrot.slane %v1922_v60, %v3134_v39  ;;  %v1861_v16 = vadd.f32 %v3462_v29, %v1804_v38 }
 0x2ef   :  { %v2087_v42 = vmax.f32 %v2071_v5, 0.0  ;;  %v1803_v3 = vadd.f32 %v1787_v10, %v3348_v35  ;;  %v1924_v43 = vcombine.high %v1920_v54, %v1920_v54  ;;  %v1790_v31 = vadd.f32 %v2770_v47, %v1728_v32 }
 0x2f0   :  { %v2073_v25 = vadd.f32 %v2057_v18, %v1861_v16  ;;  %v1789_v51 = vadd.f32 %v1724_v63, %v1439_v50  ;;  %v1792_v24 = vadd.f32 %v2773_v20, %v3444_v4  ;;  %2794 = vmatprep.mubr.msk.f32.mxu1 %vm186_vm2, %v2086_v13  ;;  %v1791_v46 = vadd.f32 %v3438_v56, %v1449_v44 }
 0x2f1   :  { %v2776_v49 = vpop.f32.mrb[16].mxu0  ;;  %v2059_v54 = vmul.f32 %v1997_v41, %v3487_v59  ;;  %v1860_v21 = vadd.f32 %v3462_v29, %v1803_v3  ;;  %v2005_v32 = vrot.slane %v1924_v43, %v3134_v39  ;;  %v1806_v47 = vadd.f32 %v1790_v31, %v3348_v35  ;;  %2795 = vmatmul.mubr.msk.f32.vlgmr.msra.gmra.mrb[8].mxu1 %vm186_vm2, %v2087_v42 }
 0x2f2   :  { %v1459_v55 = vpop.f32.mrb[17].mxu0  ;;  %v2060_v12 = vmul.f32 %v2001_v23, %v3509_v40  ;;  %v1805_v63 = vadd.f32 %v1789_v51, %v3348_v35  ;;  %v1808_v4 = vadd.f32 %v1792_v24, %v3348_v35  ;;  %v1807_v50 = vadd.f32 %v1791_v46, %v3348_v35 }
 0x2f3   :  { %v2089_v56 = vmax.f32 %v2073_v25, 0.0  ;;  %v2072_v58 = vadd.f32 %v2056_v52, %v1860_v21  ;;  %v2061_v60 = vmul.f32 %v2005_v32, %v3515_v27  ;;  %v1863_v1 = vadd.f32 %v3462_v29, %v1806_v47 }
 0x2f4   :  { %v1862_v20 = vadd.f32 %v3462_v29, %v1805_v63  ;;  %v1865_v5 = vadd.f32 %v3462_v29, %v1808_v4  ;;  %v1864_v37 = vadd.f32 %v3462_v29, %v1807_v50  ;;  %v1794_v38 = vadd.f32 %v2776_v49, %v1744_v15 }
 0x2f5   :  { %v2779_v18 = vpop.f32.mrb[18].mxu0  ;;  %v2088_v41 = vmax.f32 %v2072_v58, 0.0  ;;  %v2075_v35 = vadd.f32 %v2059_v54, %v1863_v1  ;;  %v1793_v52 = vadd.f32 %v1740_v8, %v1459_v55  ;;  %v2029_v29 = vrot.slane %v3501_v61, %v3134_v39 }
 0x2f6   :  { %v1469_v44 = vpop.f32.mrb[19].mxu0  ;;  %v1796_v10 = vadd.f32 %v2779_v18, %v3420_v22  ;;  %v2074_v13 = vadd.f32 %v2058_v19, %v1862_v20  ;;  %v2077_v23 = vadd.f32 %v2061_v60, %v1865_v5  ;;  %v2076_v16 = vadd.f32 %v2060_v12, %v1864_v37  ;;  %v2368_v37 = vld [vmem:[%s3663_s12 + $0x8] sm:$0xff] }
 0x2f7   :  { %v1810_v42 = vadd.f32 %v3346_v30, %v1794_v38  ;;  %2797 = vmatprep.mubr.msk.f32.mxu1 %vm186_vm2, %v2088_v41  ;;  %v1809_v57 = vadd.f32 %v3346_v30, %v1793_v52  ;;  %v1795_v3 = vadd.f32 %v3395_v17, %v1469_v44  ;;  %v1973_v8 = vcombine.high %v3501_v61, %v3501_v61  ;;  %v3612_v44 = vld [vmem:[%s3662_s11] ss:$0 sm:$0xff] }
 0x2f8   :  { %v1812_v15 = vadd.f32 %v3346_v30, %v1796_v10  ;;  %v2090_v22 = vmax.f32 %v2074_v13, 0.0  ;;  %v2092_v19 = vmax.f32 %v2076_v16, 0.0  ;;  %2798 = vmatmul.mubr.msk.f32.gmra.mrb[10].mxu1 %vm186_vm2, %v2089_v56  ;;  %v2066_v61 = vmul.f32 %v2025_v0, %v3479_v53 }
 0x2f9   :  { %v2782_v45 = vpop.f32.mrb[20].mxu0  ;;  %v1867_v43 = vadd.f32 %v3474_v48, %v1810_v42  ;;  %v1866_v49 = vadd.f32 %v3474_v48, %v1809_v57  ;;  %v1811_v51 = vadd.f32 %v3346_v30, %v1795_v3  ;;  %v2091_v24 = vmax.f32 %v2075_v35, 0.0 }
 0x2fa   :  { %v1479_v31 = vpop.f32.mrb[21].mxu0  ;;  %v1869_v25 = vadd.f32 %v3474_v48, %v1812_v15  ;;  %v1798_v17 = vadd.f32 %v2782_v45, %v1760_v6  ;;  %2800 = vmatprep.mubr.msk.f32.mxu1 %vm186_vm2, %v2090_v22  ;;  %v2033_v53 = vrot.slane %v1971_v34, %v3134_v39  ;;  %v2093_v11 = vmax.f32 %v2077_v23, 0.0 }
 0x2fb   :  { %v2079_v46 = vadd.f32 %v3492_v62, %v1867_v43  ;;  %v1797_v55 = vadd.f32 %v1756_v9, %v1479_v31  ;;  %v2078_v54 = vadd.f32 %v3459_v28, %v1866_v49  ;;  %v1868_v26 = vadd.f32 %v3474_v48, %v1811_v51 }
 0x2fc   :  { %v2081_v21 = vadd.f32 %v3495_v33, %v1869_v25  ;;  %v1814_v6 = vadd.f32 %v3346_v30, %v1798_v17  ;;  %v2037_v62 = vrot.slane %v1973_v8, %v3134_v39  ;;  %2801 = vmatmul.mubr.msk.f32.gmra.mrb[12].mxu1 %vm186_vm2, %v2091_v24  ;;  %v2067_v33 = vmul.f32 %v2029_v29, %v3487_v59 }
 0x2fd   :  { %v2785_v32 = vpop.f32.mrb[22].mxu0  ;;  %v1813_v36 = vadd.f32 %v3346_v30, %v1797_v55  ;;  %v2094_v0 = vmax.f32 %v2078_v54, 0.0  ;;  %v2080_v47 = vadd.f32 %v3490_v2, %v1868_v26  ;;  %2803 = vmatprep.mubr.msk.f32.mxu1 %vm186_vm2, %v2092_v19  ;;  %v2068_v58 = vmul.f32 %v2033_v53, %v3509_v40 }
 0x2fe   :  { %v1800_v9 = vadd.f32 %v2785_v32, %v3453_v14  ;;  %v1489_v28 = vpop.f32.mrb[23].mxu0  ;;  %v1871_v12 = vadd.f32 %v3474_v48, %v1814_v6  ;;  %v2069_v14 = vmul.f32 %v2037_v62, %v3515_v27  ;;  %v2095_v60 = vmax.f32 %v2079_v46, 0.0 }
 0x2ff   :  { %v1870_v34 = vadd.f32 %v3474_v48, %v1813_v36  ;;  %v1799_v63 = vadd.f32 %v3456_v7, %v1489_v28  ;;  %v2096_v56 = vmax.f32 %v2080_v47, 0.0  ;;  %v2097_v20 = vmax.f32 %v2081_v21, 0.0 }
 0x300   :  { %v1816_v39 = vadd.f32 %v3346_v30, %v1800_v9  ;;  %v2083_v4 = vadd.f32 %v2067_v33, %v1871_v12  ;;  %2804 = vmatmul.mubr.msk.f32.gmra.mrb[14].mxu1 %vm186_vm2, %v2093_v11 }
 0x301   :  { %v2082_v50 = vadd.f32 %v2066_v61, %v1870_v34  ;;  %v1815_v2 = vadd.f32 %v3346_v30, %v1799_v63  ;;  %2806 = vmatprep.mubr.msk.f32.mxu1 %vm186_vm2, %v2094_v0 }
 0x302   :  { %v1873_v59 = vadd.f32 %v3474_v48, %v1816_v39  ;;  %v2099_v30 = vmax.f32 %v2083_v4, 0.0 }
 0x303   :  { %v1872_v18 = vadd.f32 %v3474_v48, %v1815_v2  ;;  %v2098_v27 = vmax.f32 %v2082_v50, 0.0  ;;  %v2367_v48 = vld [vmem:[%s3663_s12] sm:$0xff] }
 0x304   :  { %v2085_v1 = vadd.f32 %v2069_v14, %v1873_v59  ;;  %2807 = vmatmul.mubr.msk.f32.gmra.mrb[16].mxu1 %vm186_vm2, %v2095_v60  ;;  %v2922_v38 = vpack.c.bf16 %v2368_v37, %v2367_v48 }
 0x305   :  { %v2084_v7 = vadd.f32 %v2068_v58, %v1872_v18  ;;  %2809 = vmatprep.mubr.msk.f32.mxu1 %vm186_vm2, %v2096_v56 }
 0x306   :  { %v2101_v40 = vmax.f32 %v2085_v1, 0.0  ;;  %2923 = vmatpush3.bf16.msra.mxu0 %v2922_v38 }
 0x307   :  { %v2100_v5 = vmax.f32 %v2084_v7, 0.0 }
 0x308   :  { %2810 = vmatmul.mubr.msk.f32.gmra.mrb[18].mxu1 %vm186_vm2, %v2097_v20 }
 0x309   :  { %2812 = vmatprep.mubr.msk.f32.mxu1 %vm186_vm2, %v2098_v27 }
 0x30c   :  { %2813 = vmatmul.mubr.msk.f32.gmra.mrb[20].mxu1 %vm186_vm2, %v2099_v30 }
 0x30d   :  { %2815 = vmatprep.mubr.msk.f32.mxu1 %vm186_vm2, %v2100_v5 }
 0x310   :  { %2816 = vmatmul.mubr.msk.f32.gmra.mrb[22].mxu1 %vm186_vm2, %v2101_v40 }
 0x3c4   :  { %v2796_v41 = vpop.f32.mrb[8].mxu1 }
 0x3c5   :  { %v2233_v35 = vadd.f32 %v2796_v41, %v3612_v44  ;;  %v2227_v52 = vpop.f32.mrb[9].mxu1 }
 0x3c6   :  { %v2228_v10 = vadd.f32 %v3612_v44, %v2227_v52 }
 0x3c7   :  { %v2307_v13 = vmax.f32 %v2233_v35, 0.0 }
 0x3c8   :  { %v2306_v23 = vmax.f32 %v2228_v10, 0.0 }
 0x3c9   :  { %v2324_v16 = vsel %vm2322_vm6, %v2307_v13, 0.0 }
 0x3ca   :  { %v2323_v42 = vsel %vm2322_vm6, %v2306_v23, 0.0 }
 0x3cb   :  { %v2325_v29 = vadd.f32 %v2324_v16, %v2323_v42  ;;  %v2799_v57 = vpop.f32.mrb[10].mxu1 }
 0x3cc   :  { %v2243_v15 = vadd.f32 %v2799_v57, %v3612_v44  ;;  %v2237_v3 = vpop.f32.mrb[11].mxu1 }
 0x3cd   :  { %v2238_v45 = vadd.f32 %v3612_v44, %v2237_v3 }
 0x3ce   :  { %v2309_v8 = vmax.f32 %v2243_v15, 0.0 }
 0x3cf   :  { %v2308_v22 = vmax.f32 %v2238_v45, 0.0  ;;  %v2802_v19 = vpop.f32.mrb[12].mxu1 }
 0x3d0   :  { %v2253_v43 = vadd.f32 %v2802_v19, %v3612_v44  ;;  %v2247_v31 = vpop.f32.mrb[13].mxu1  ;;  %v2328_v17 = vsel %vm2322_vm6, %v2309_v8, 0.0 }
 0x3d1   :  { %v2326_v49 = vsel %vm2322_vm6, %v2308_v22, 0.0  ;;  %v2248_v25 = vadd.f32 %v3612_v44, %v2247_v31 }
 0x3d2   :  { %v2327_v51 = vadd.f32 %v2326_v49, %v2325_v29  ;;  %v2311_v61 = vmax.f32 %v2253_v43, 0.0 }
 0x3d3   :  { %v2310_v24 = vmax.f32 %v2248_v25, 0.0  ;;  %v2805_v46 = vpop.f32.mrb[14].mxu1 }
 0x3d4   :  { %v2329_v55 = vadd.f32 %v2328_v17, %v2327_v51  ;;  %v2263_v54 = vadd.f32 %v2805_v46, %v3612_v44  ;;  %v2257_v21 = vpop.f32.mrb[15].mxu1  ;;  %v2332_v53 = vsel %vm2322_vm6, %v2311_v61, 0.0 }
 0x3d5   :  { %v2330_v26 = vsel %vm2322_vm6, %v2310_v24, 0.0  ;;  %v2258_v6 = vadd.f32 %v3612_v44, %v2257_v21 }
 0x3d6   :  { %v2331_v32 = vadd.f32 %v2330_v26, %v2329_v55  ;;  %v2313_v62 = vmax.f32 %v2263_v54, 0.0 }
 0x3d7   :  { %v2312_v36 = vmax.f32 %v2258_v6, 0.0  ;;  %v2808_v9 = vpop.f32.mrb[16].mxu1  ;;  %v2518_v6 = vld [vmem:[#allocation2] ss:$0 sm:$0xff] }
 0x3d8   :  { %v2333_v28 = vadd.f32 %v2332_v53, %v2331_v32  ;;  %v2273_v33 = vadd.f32 %v2808_v9, %v3612_v44  ;;  %v2267_v0 = vpop.f32.mrb[17].mxu1  ;;  %v2336_v39 = vsel %vm2322_vm6, %v2313_v62, 0.0 }
 0x3d9   :  { %v2334_v47 = vsel %vm2322_vm6, %v2312_v36, 0.0  ;;  %v2268_v12 = vadd.f32 %v3612_v44, %v2267_v0 }
 0x3da   :  { %v2335_v11 = vadd.f32 %v2334_v47, %v2333_v28  ;;  %v2315_v34 = vmax.f32 %v2273_v33, 0.0 }
 0x3db   :  { %v2314_v63 = vmax.f32 %v2268_v12, 0.0  ;;  %v2811_v4 = vpop.f32.mrb[18].mxu1 }
 0x3dc   :  { %v2337_v14 = vadd.f32 %v2336_v39, %v2335_v11  ;;  %v2345_v50 = vsel %vm2322_vm6, %v2315_v34, 0.0  ;;  %v2283_v59 = vadd.f32 %v2811_v4, %v3612_v44  ;;  %v2277_v2 = vpop.f32.mrb[19].mxu1 }
 0x3dd   :  { %v2344_v56 = vsel %vm2322_vm6, %v2314_v63, 0.0  ;;  %v2278_v58 = vadd.f32 %v3612_v44, %v2277_v2 }
 0x3de   :  { %v2346_v60 = vadd.f32 %v2345_v50, %v2344_v56  ;;  %v2317_v1 = vmax.f32 %v2283_v59, 0.0  ;;  %v2338_v40 = vrot.slane %v2337_v14, 4 }
 0x3df   :  { %v2316_v18 = vmax.f32 %v2278_v58, 0.0  ;;  %v2814_v7 = vpop.f32.mrb[20].mxu1 }
 0x3e0   :  { %v2293_v27 = vadd.f32 %v2814_v7, %v3612_v44  ;;  %v2287_v20 = vpop.f32.mrb[21].mxu1  ;;  %v2349_v37 = vsel %vm2322_vm6, %v2317_v1, 0.0  ;;  %v2339_v42 = vadd.f32 %v2338_v40, %v2337_v14 }
 0x3e1   :  { %v2347_v5 = vsel %vm2322_vm6, %v2316_v18, 0.0  ;;  %v2288_v30 = vadd.f32 %v3612_v44, %v2287_v20 }
 0x3e2   :  { %v2348_v48 = vadd.f32 %v2347_v5, %v2346_v60  ;;  %v2319_v38 = vmax.f32 %v2293_v27, 0.0  ;;  %v2340_v22 = vrot.slane %v2339_v42, 2 }
 0x3e3   :  { %v2318_v41 = vmax.f32 %v2288_v30, 0.0  ;;  %v2817_v35 = vpop.f32.mrb[22].mxu1 }
 0x3e4   :  { %v2350_v52 = vadd.f32 %v2349_v37, %v2348_v48  ;;  %v2303_v10 = vadd.f32 %v2817_v35, %v3612_v44  ;;  %v2297_v13 = vpop.f32.mrb[23].mxu1  ;;  %v2353_v57 = vsel %vm2322_vm6, %v2319_v38, 0.0  ;;  %v2341_v49 = vadd.f32 %v2340_v22, %v2339_v42 }
 0x3e5   :  { %v2351_v23 = vsel %vm2322_vm6, %v2318_v41, 0.0  ;;  %v2298_v16 = vadd.f32 %v3612_v44, %v2297_v13 }
 0x3e6   :  { %v2352_v29 = vadd.f32 %v2351_v23, %v2350_v52  ;;  %v2321_v15 = vmax.f32 %v2303_v10, 0.0  ;;  %v2342_v17 = vrot.slane %v2341_v49, 1 }
 0x3e7   :  { %v2320_v3 = vmax.f32 %v2298_v16, 0.0 }
 0x3e8   :  { %v2354_v45 = vadd.f32 %v2353_v57, %v2352_v29  ;;  %v2357_v43 = vsel %vm2322_vm6, %v2321_v15, 0.0  ;;  %v2343_v24 = vadd.f32 %v2342_v17, %v2341_v49 }
 0x3e9   :  { %v2355_v8 = vsel %vm2322_vm6, %v2320_v3, 0.0 }
 0x3ea   :  { %v2356_v19 = vadd.f32 %v2355_v8, %v2354_v45  ;;  %v2365_v54 = vmax.f32 %v2343_v24, 0.0 }
 0x3ec   :  { %v2358_v31 = vadd.f32 %v2357_v43, %v2356_v19 }
 0x3ee   :  { %v2359_v25 = vrot.slane %v2358_v31, 4 }
 0x3f0   :  { %v2360_v51 = vadd.f32 %v2359_v25, %v2358_v31 }
 0x3f2   :  { %v2361_v61 = vrot.slane %v2360_v51, 2 }
 0x3f4   :  { %v2362_v44 = vadd.f32 %v2361_v61, %v2360_v51 }
 0x3f6   :  { %v2363_v46 = vrot.slane %v2362_v44, 1 }
 0x3f8   :  { %v2364_v55 = vadd.f32 %v2363_v46, %v2362_v44 }
 0x3fa   :  { %v2366_v21 = vmax.f32 %v2364_v55, 0.0 }
 0x3fc   :  { %v2378_v26 = vsel %vm806_vm4, %v2366_v21, %v2365_v54 }
 0x3fd   :  { %2823 = vmatmul.mubr.msk.f32.vlgmr.msra.gmra.mrb[24].mxu0 %vm2322_vm6, %v2378_v26 }
 0x4d0   :  { %v2447_v32 = vpop.f32.mrb[24].mxu0 }
 0x4d1   :  { %v2448_v53 = vadd.f32 %v2518_v6, %v2447_v32  ;;  %v2824_v62 = vpop.f32.mrb[25].mxu0 }
 0x4d3   :  { %2452 = vst.msk [vmem:[%s3665_s14] sm:$0x3] %vm2451_vm7, %v2448_v53 }
 0x4d4   :  { %2457 = vsyncpa [#allocation4], 1 }
 0x4d5   :  { %2458 = vsyncpa [#allocation6], 1 }

</bundles_post_ra>
